<compile_context>
chip_gen: v5e
topology: v5e:2x2
jax: 0.10.0
libtpu: 0.0.40
codegen_flags: <defaults>
</compile_context>

<pallas_src>
import jax
import jax.numpy as jnp
import numpy as np
from jax.experimental import pallas as pl
from jax.experimental.pallas import tpu as pltpu

KERNEL_SIZES = (3, 4, 5)
LANE = 128


def _round_up(x, m):
    return (x + m - 1) // m * m


def textcnn_kernel(ids_ref, embed_ref, wconv_ref, bconv_ref, wfc_ref, bfc_ref,
                   out_ref):
    """Embedding + Conv1d(ks=3,4,5) + ReLU + global max pool + Linear, one tile.

    ids_ref  : (TB, L)            int32 token ids
    embed_ref: (V_pad, E_pad)     bf16 embedding table (VMEM resident)
    wconv_ref: (E_pad, 12*C_pad)  bf16 conv weights, one C_pad slab per (branch, tap)
    bconv_ref: (3, C_pad)         f32 conv biases (zero padded)
    wfc_ref  : (3*C_pad, O_pad)   bf16 fc weight (zero padded)
    bfc_ref  : (1, O_pad)         f32 fc bias
    out_ref  : (TB, O_pad)        f32 logits
    """
    TB, L = ids_ref.shape
    V, E = embed_ref.shape
    C = bconv_ref.shape[1]          # padded channel count (multiple of 128)
    N = TB * L

    # --- Embedding gather fused as a one-hot MXU matmul ---------------------
    ids = ids_ref[...]                                               # (TB, L)
    vocab_iota = jax.lax.broadcasted_iota(jnp.int32, (TB, L, V), 2)
    onehot = (vocab_iota == ids[:, :, None]).astype(jnp.bfloat16).reshape(N, V)
    x = jnp.dot(onehot, embed_ref[...],
                preferred_element_type=jnp.float32).astype(jnp.bfloat16)  # (N, E)

    # Hoisted one-lane time index, reused by every branch's validity mask.
    t_idx = jax.lax.broadcasted_iota(jnp.int32, (TB, L, 1), 1)

    pooled = []
    col = 0
    for bi, ks in enumerate(KERNEL_SIZES):
        # Per-branch MXU call; y[:, k*C:(k+1)*C] holds tap k of this branch.
        y = jnp.dot(x, wconv_ref[:, col * C:(col + ks) * C],
                    preferred_element_type=jnp.float32)              # (N, ks*C)
        col += ks
        # conv_sh[b, t, c] = conv[b, t-(ks-1), c] (valid for t >= ks-1), built
        # as a sum of rolled, lane-aligned slabs (XLU rolls + VPU adds).
        acc = None
        for k in range(ks):
            slab = y[:, k * C:(k + 1) * C]                           # (N, C)
            s = ks - 1 - k
            if s:
                slab = pltpu.roll(slab, shift=s, axis=0)             # XLU rotate
            acc = slab if acc is None else acc + slab
        conv = jnp.maximum(acc + bconv_ref[bi:bi + 1, :], 0.0).reshape(TB, L, C)
        # Positions t < ks-1 have no full window (and the rolled rows there may
        # have wrapped across batch boundaries).  ReLU output >= 0, so masking
        # them to 0 leaves the global max over time unchanged.
        conv = jnp.where(t_idx >= ks - 1, conv, 0.0)
        pooled.append(jnp.max(conv, axis=1))                         # (TB, C)

    # --- Single FC matmul over the lane-concatenated pooled features --------
    feat = jnp.concatenate(pooled, axis=-1).astype(jnp.bfloat16)     # (TB, 3*C)
    out_ref[...] = bfc_ref[...] + jnp.dot(feat, wfc_ref[...],
                                          preferred_element_type=jnp.float32)


def prepare_params(params):
    """One-time weight layout, hoisted out of the per-forward path: transpose,
    zero-pad to 128-lane multiples, cast matmul operands to bf16."""
    V, E = params["embed"].shape
    C = params["conv3_b"].shape[0]
    O = params["fc_b"].shape[0]
    V_pad = _round_up(V, LANE)     # one-hot gather feeds the MXU K dimension
    E_pad = _round_up(E, LANE)
    C_pad = _round_up(C, LANE)
    O_pad = _round_up(O, LANE)

    embed = jnp.pad(params["embed"],
                    ((0, V_pad - V), (0, E_pad - E))).astype(jnp.bfloat16)

    wconv_cols, bconv_rows = [], []
    for ks in KERNEL_SIZES:
        w = params[f"conv{ks}_w"]                          # (C, E, ks)
        for k in range(ks):
            wk = jnp.pad(w[:, :, k].T, ((0, E_pad - E), (0, C_pad - C)))
            wconv_cols.append(wk)                          # (E_pad, C_pad)
        bconv_rows.append(jnp.pad(params[f"conv{ks}_b"], (0, C_pad - C)))
    wconv = jnp.concatenate(wconv_cols, axis=1).astype(jnp.bfloat16)  # (E_pad, 12*C_pad)
    bconv = jnp.stack(bconv_rows, axis=0).astype(jnp.float32)         # (3, C_pad)

    fc_w = params["fc_w"]                                  # (O, 3C)
    wfc_rows = []
    for i in range(len(KERNEL_SIZES)):
        blk = fc_w[:, i * C:(i + 1) * C].T                 # (C, O)
        wfc_rows.append(jnp.pad(blk, ((0, C_pad - C), (0, O_pad - O))))
    wfc = jnp.concatenate(wfc_rows, axis=0).astype(jnp.bfloat16)      # (3*C_pad, O_pad)
    bfc = jnp.pad(params["fc_b"], (0, O_pad - O)).reshape(1, O_pad).astype(jnp.float32)

    return dict(embed=embed, wconv=wconv, bconv=bconv, wfc=wfc, bfc=bfc,
                dims=dict(V_pad=V_pad, E_pad=E_pad, C_pad=C_pad,
                          O_pad=O_pad, O=O))


def _vmem_capacity_bytes():
    """Per-TensorCore VMEM capacity; conservative 64 MiB (v7x) fallback."""
    try:
        return int(pltpu.get_tpu_info().vmem_capacity_bytes)
    except Exception:
        return 64 << 20


def _tile_vmem_bytes(TB, L, V_pad, E_pad, C_pad, O_pad):
    """Rough per-grid-step VMEM estimate: double-buffered I/O tiles + resident
    weights (2 buffers each by default) + in-kernel temporaries."""
    bf16, f32, i32 = 2, 4, 4
    N = TB * L
    n_cols = sum(KERNEL_SIZES) * C_pad
    io = 2 * (TB * L * i32 + TB * O_pad * f32)
    weights = 2 * (V_pad * E_pad * bf16 + E_pad * n_cols * bf16
                   + len(KERNEL_SIZES) * C_pad * f32
                   + len(KERNEL_SIZES) * C_pad * O_pad * bf16 + O_pad * f32)
    work = (N * V_pad * (i32 + bf16)                      # vocab iota + one-hot
            + N * E_pad * (f32 + bf16)                    # gathered activations
            + N * max(KERNEL_SIZES) * C_pad * f32         # largest per-branch y
            + 2 * N * C_pad * f32                         # conv / masked conv
            + 2 * len(KERNEL_SIZES) * TB * C_pad * f32)   # pooled + feat
    return io + weights + work


def _choose_tb(B, L, V_pad, E_pad, C_pad, O_pad, budget):
    """Largest batch tile (multiple of 8, <=256) whose VMEM estimate fits."""
    if B <= 8:
        return B
    tb = 8
    max_tb = min(256, _round_up(B, 8))
    for cand in range(16, max_tb + 1, 8):
        if _tile_vmem_bytes(cand, L, V_pad, E_pad, C_pad, O_pad) <= budget:
            tb = cand
        else:
            break
    return tb


def textcnn_forward(token_ids, prep):
    d = prep["dims"]
    V_pad, E_pad, C_pad, O_pad, O = (d["V_pad"], d["E_pad"], d["C_pad"],
                                     d["O_pad"], d["O"])
    B, L = token_ids.shape
    assert L >= max(KERNEL_SIZES), "sequence must be >= the largest kernel size"

    capacity = _vmem_capacity_bytes()
    budget = int(0.70 * capacity)          # headroom for compiler scratch, never full VMEM
    TB = _choose_tb(B, L, V_pad, E_pad, C_pad, O_pad, budget)
    B_pad = -(-B // TB) * TB
    if B_pad != B:
        token_ids = jnp.pad(token_ids, ((0, B_pad - B), (0, 0)))
    token_ids = token_ids.astype(jnp.int32)

    n_branches = len(KERNEL_SIZES)
    n_cols = sum(KERNEL_SIZES) * C_pad
    vmem_limit = min(
        budget,
        max(int(1.5 * _tile_vmem_bytes(TB, L, V_pad, E_pad, C_pad, O_pad)),
            8 << 20))

    out = pl.pallas_call(
        textcnn_kernel,
        out_shape=jax.ShapeDtypeStruct((B_pad, O_pad), jnp.float32),
        grid_spec=pltpu.PrefetchScalarGridSpec(
            num_scalar_prefetch=0,
            grid=(B_pad // TB,),
            in_specs=[
                pl.BlockSpec((TB, L), lambda i: (i, 0)),               # pipelined ids
                # NOTE: the specs below are grid-invariant (resident weights).
                # pipeline_mode=pl.Buffered(1) would shave their spare buffer.
                pl.BlockSpec((V_pad, E_pad), lambda i: (0, 0)),
                pl.BlockSpec((E_pad, n_cols), lambda i: (0, 0)),
                pl.BlockSpec((n_branches, C_pad), lambda i: (0, 0)),
                pl.BlockSpec((n_branches * C_pad, O_pad), lambda i: (0, 0)),
                pl.BlockSpec((1, O_pad), lambda i: (0, 0)),
            ],
            out_specs=pl.BlockSpec((TB, O_pad), lambda i: (i, 0)),
        ),
        compiler_params=pltpu.CompilerParams(
            dimension_semantics=("parallel",),                         # megacore / 2 TCs
            vmem_limit_bytes=int(vmem_limit),
        ),
    )(token_ids, prep["embed"], prep["wconv"], prep["bconv"],
      prep["wfc"], prep["bfc"])
    return out[:B, :O]


def make_params(key, vocab_size, embed_dim, n_channels, output_size,
                kernel_sizes=KERNEL_SIZES):
    keys = jax.random.split(key, 2 + 2 * len(kernel_sizes) + 2)
    params = {}
    params["embed"] = jax.random.normal(keys[0], (vocab_size, embed_dim), jnp.float32)
    i = 1
    for ks in kernel_sizes:
        params[f"conv{ks}_w"] = 0.1 * jax.random.normal(
            keys[i], (n_channels, embed_dim, ks), jnp.float32)
        params[f"conv{ks}_b"] = 0.1 * jax.random.normal(
            keys[i + 1], (n_channels,), jnp.float32)
        i += 2
    params["fc_w"] = 0.1 * jax.random.normal(
        keys[i], (output_size, n_channels * len(kernel_sizes)), jnp.float32)
    params["fc_b"] = 0.1 * jax.random.normal(
        keys[i + 1], (output_size,), jnp.float32)
    return params


def textcnn_reference(token_ids, params):
    """Pure-JAX f32 reference mirroring the PyTorch forward, for verification."""
    x = jnp.take(params["embed"], token_ids, axis=0)         # (B, L, E)
    pooled = []
    for ks in KERNEL_SIZES:
        w = params[f"conv{ks}_w"]                            # (C, E, ks)
        b = params[f"conv{ks}_b"]
        B, L, E = x.shape
        L_out = L - ks + 1
        conv = jnp.zeros((B, L_out, w.shape[0]), jnp.float32)
        for k in range(ks):
            conv = conv + jnp.einsum("ble,ce->blc", x[:, k:k + L_out, :], w[:, :, k])
        conv = jax.nn.relu(conv + b[None, None, :])
        pooled.append(jnp.max(conv, axis=1))
    feat = jnp.concatenate(pooled, axis=1)
    return feat @ params["fc_w"].T + params["fc_b"]


if __name__ == "__main__":
    # Small shapes consistent with the module's forward.
    batch, seq_len = 2, 16
    vocab_size, embed_dim = 50, 32
    n_channels, output_size = 32, 20

    key = jax.random.PRNGKey(0)
    pkey, ikey = jax.random.split(key)
    params = make_params(pkey, vocab_size, embed_dim, n_channels, output_size)
    token_ids = jax.random.randint(ikey, (batch, seq_len), 0, vocab_size,
                                   dtype=jnp.int32)

    prep = prepare_params(params)              # one-time weight layout (hoisted)
    out = textcnn_forward(token_ids, prep)
    out = jax.block_until_ready(out)

    ref = textcnn_reference(token_ids, params)
    # The kernel feeds the MXU bf16 operands (f32 accumulation) and uses a bf16
    # embedding table, so compare against the f32 reference at bf16 tolerance.
    np.testing.assert_allclose(np.asarray(out), np.asarray(ref), rtol=2e-2, atol=2e-2)
    print("KERNEL_OK")
</pallas_src>

<mosaic_0001>
module attributes {stable_mosaic.version = 11 : i64} {
  func.func @textcnn_kernel(%arg0: i32, %arg1: memref<2x16xi32, #tpu.memory_space<vmem>>, %arg2: memref<128x128xbf16, #tpu.memory_space<vmem>>, %arg3: memref<128x1536xbf16, #tpu.memory_space<vmem>>, %arg4: memref<3x128xf32, #tpu.memory_space<vmem>>, %arg5: memref<384x128xbf16, #tpu.memory_space<vmem>>, %arg6: memref<1x128xf32, #tpu.memory_space<vmem>>, %arg7: memref<2x128xf32, #tpu.memory_space<vmem>>) attributes {dimension_semantics = [#tpu.dimension_semantics<parallel>], iteration_bounds = array<i64: 1>, scalar_prefetch = 0 : i64, scratch_operands = 0 : i64, tpu.core_type = #tpu.core_type<tc>, window_params = [{transform_indices = @transform_0, window_bounds = array<i64: 2, 16>}, {pipeline_mode = #tpu.pipeline_mode<synchronous>, transform_indices = @transform_1, window_bounds = array<i64: 128, 128>}, {pipeline_mode = #tpu.pipeline_mode<synchronous>, transform_indices = @transform_2, window_bounds = array<i64: 128, 1536>}, {pipeline_mode = #tpu.pipeline_mode<synchronous>, transform_indices = @transform_3, window_bounds = array<i64: 3, 128>}, {pipeline_mode = #tpu.pipeline_mode<synchronous>, transform_indices = @transform_4, window_bounds = array<i64: 384, 128>}, {pipeline_mode = #tpu.pipeline_mode<synchronous>, transform_indices = @transform_5, window_bounds = array<i64: 1, 128>}, {transform_indices = @transform_6, window_bounds = array<i64: 2, 128>}]} {
    %c0 = arith.constant 0 : index
    %c0_0 = arith.constant 0 : index
    %0 = vector.load %arg1[%c0, %c0_0] : memref<2x16xi32, #tpu.memory_space<vmem>>, vector<2x16xi32>
    %1 = tpu.iota {dimensions = array<i32: 2>} : vector<2x16x128xi32>
    %2 = vector.shape_cast %0 : vector<2x16xi32> to vector<2x16x1xi32>
    %3 = vector.broadcast %2 : vector<2x16x1xi32> to vector<2x16x128xi32>
    %4 = arith.cmpi eq, %1, %3 : vector<2x16x128xi32>
    %5 = arith.extui %4 : vector<2x16x128xi1> to vector<2x16x128xi32>
    %6 = arith.sitofp %5 : vector<2x16x128xi32> to vector<2x16x128xf32>
    %7 = arith.truncf %6 : vector<2x16x128xf32> to vector<2x16x128xbf16>
    %8 = vector.shape_cast %7 : vector<2x16x128xbf16> to vector<32x128xbf16>
    %c0_1 = arith.constant 0 : index
    %c0_2 = arith.constant 0 : index
    %9 = vector.load %arg2[%c0_1, %c0_2] : memref<128x128xbf16, #tpu.memory_space<vmem>>, vector<128x128xbf16>
    %cst = arith.constant dense<0.000000e+00> : vector<32x128xf32>
    %10 = tpu.matmul %8, %9, %cst {dimension_numbers = #tpu.dot_dimension_numbers<[1], [0], [0], [1], [0, 0, 1, 1], [], []>} : vector<32x128xbf16>, vector<128x128xbf16>, vector<32x128xf32> -> vector<32x128xf32>
    %11 = arith.truncf %10 : vector<32x128xf32> to vector<32x128xbf16>
    %12 = tpu.iota {dimensions = array<i32: 1>} : vector<2x16x1xi32>
    %c0_3 = arith.constant 0 : index
    %c0_4 = arith.constant 0 : index
    %13 = vector.load %arg3[%c0_3, %c0_4] : memref<128x1536xbf16, #tpu.memory_space<vmem>>, vector<128x384xbf16>
    %cst_5 = arith.constant dense<0.000000e+00> : vector<32x384xf32>
    %14 = tpu.matmul %11, %13, %cst_5 {dimension_numbers = #tpu.dot_dimension_numbers<[1], [0], [0], [1], [0, 0, 1, 1], [], []>} : vector<32x128xbf16>, vector<128x384xbf16>, vector<32x384xf32> -> vector<32x384xf32>
    %15 = vector.extract_strided_slice %14 {offsets = [0, 0], sizes = [32, 128], strides = [1, 1]} : vector<32x384xf32> to vector<32x128xf32>
    %c2_i32 = arith.constant 2 : i32
    %16 = tpu.dynamic_rotate %15 by %c2_i32 dim 0 : vector<32x128xf32>, i32 -> vector<32x128xf32>
    %17 = vector.extract_strided_slice %14 {offsets = [0, 128], sizes = [32, 128], strides = [1, 1]} : vector<32x384xf32> to vector<32x128xf32>
    %c1_i32 = arith.constant 1 : i32
    %18 = tpu.dynamic_rotate %17 by %c1_i32 dim 0 : vector<32x128xf32>, i32 -> vector<32x128xf32>
    %19 = arith.addf %16, %18 : vector<32x128xf32>
    %20 = vector.extract_strided_slice %14 {offsets = [0, 256], sizes = [32, 128], strides = [1, 1]} : vector<32x384xf32> to vector<32x128xf32>
    %21 = arith.addf %19, %20 : vector<32x128xf32>
    %c0_6 = arith.constant 0 : index
    %c0_7 = arith.constant 0 : index
    %22 = vector.load %arg4[%c0_6, %c0_7] : memref<3x128xf32, #tpu.memory_space<vmem>>, vector<1x128xf32>
    %23 = vector.broadcast %22 : vector<1x128xf32> to vector<32x128xf32>
    %24 = arith.addf %21, %23 : vector<32x128xf32>
    %cst_8 = arith.constant 0.000000e+00 : f32
    %25 = vector.broadcast %cst_8 : f32 to vector<32x128xf32>
    %26 = arith.maximumf %24, %25 : vector<32x128xf32>
    %27 = vector.shape_cast %26 : vector<32x128xf32> to vector<2x16x128xf32>
    %c2_i32_9 = arith.constant 2 : i32
    %28 = vector.broadcast %c2_i32_9 : i32 to vector<2x16x1xi32>
    %29 = arith.cmpi sge, %12, %28 : vector<2x16x1xi32>
    %cst_10 = arith.constant 0.000000e+00 : f32
    %30 = vector.shape_cast %29 : vector<2x16x1xi1> to vector<2x16x1xi1>
    %31 = vector.broadcast %30 : vector<2x16x1xi1> to vector<2x16x128xi1>
    %32 = vector.broadcast %cst_10 : f32 to vector<2x16x128xf32>
    %33 = arith.select %31, %27, %32 : vector<2x16x128xi1>, vector<2x16x128xf32>
    %cst_11 = arith.constant dense<0xFF800000> : vector<2x128xf32>
    %34 = vector.multi_reduction <maximumf>, %33, %cst_11 [1] : vector<2x16x128xf32> to vector<2x128xf32>
    %c0_12 = arith.constant 0 : index
    %c384 = arith.constant 384 : index
    %35 = vector.load %arg3[%c0_12, %c384] : memref<128x1536xbf16, #tpu.memory_space<vmem>>, vector<128x512xbf16>
    %cst_13 = arith.constant dense<0.000000e+00> : vector<32x512xf32>
    %36 = tpu.matmul %11, %35, %cst_13 {dimension_numbers = #tpu.dot_dimension_numbers<[1], [0], [0], [1], [0, 0, 1, 1], [], []>} : vector<32x128xbf16>, vector<128x512xbf16>, vector<32x512xf32> -> vector<32x512xf32>
    %37 = vector.extract_strided_slice %36 {offsets = [0, 0], sizes = [32, 128], strides = [1, 1]} : vector<32x512xf32> to vector<32x128xf32>
    %c3_i32 = arith.constant 3 : i32
    %38 = tpu.dynamic_rotate %37 by %c3_i32 dim 0 : vector<32x128xf32>, i32 -> vector<32x128xf32>
    %39 = vector.extract_strided_slice %36 {offsets = [0, 128], sizes = [32, 128], strides = [1, 1]} : vector<32x512xf32> to vector<32x128xf32>
    %c2_i32_14 = arith.constant 2 : i32
    %40 = tpu.dynamic_rotate %39 by %c2_i32_14 dim 0 : vector<32x128xf32>, i32 -> vector<32x128xf32>
    %41 = arith.addf %38, %40 : vector<32x128xf32>
    %42 = vector.extract_strided_slice %36 {offsets = [0, 256], sizes = [32, 128], strides = [1, 1]} : vector<32x512xf32> to vector<32x128xf32>
    %c1_i32_15 = arith.constant 1 : i32
    %43 = tpu.dynamic_rotate %42 by %c1_i32_15 dim 0 : vector<32x128xf32>, i32 -> vector<32x128xf32>
    %44 = arith.addf %41, %43 : vector<32x128xf32>
    %45 = vector.extract_strided_slice %36 {offsets = [0, 384], sizes = [32, 128], strides = [1, 1]} : vector<32x512xf32> to vector<32x128xf32>
    %46 = arith.addf %44, %45 : vector<32x128xf32>
    %c1 = arith.constant 1 : index
    %c0_16 = arith.constant 0 : index
    %47 = vector.load %arg4[%c1, %c0_16] : memref<3x128xf32, #tpu.memory_space<vmem>>, vector<1x128xf32>
    %48 = vector.broadcast %47 : vector<1x128xf32> to vector<32x128xf32>
    %49 = arith.addf %46, %48 : vector<32x128xf32>
    %cst_17 = arith.constant 0.000000e+00 : f32
    %50 = vector.broadcast %cst_17 : f32 to vector<32x128xf32>
    %51 = arith.maximumf %49, %50 : vector<32x128xf32>
    %52 = vector.shape_cast %51 : vector<32x128xf32> to vector<2x16x128xf32>
    %c3_i32_18 = arith.constant 3 : i32
    %53 = vector.broadcast %c3_i32_18 : i32 to vector<2x16x1xi32>
    %54 = arith.cmpi sge, %12, %53 : vector<2x16x1xi32>
    %cst_19 = arith.constant 0.000000e+00 : f32
    %55 = vector.shape_cast %54 : vector<2x16x1xi1> to vector<2x16x1xi1>
    %56 = vector.broadcast %55 : vector<2x16x1xi1> to vector<2x16x128xi1>
    %57 = vector.broadcast %cst_19 : f32 to vector<2x16x128xf32>
    %58 = arith.select %56, %52, %57 : vector<2x16x128xi1>, vector<2x16x128xf32>
    %cst_20 = arith.constant dense<0xFF800000> : vector<2x128xf32>
    %59 = vector.multi_reduction <maximumf>, %58, %cst_20 [1] : vector<2x16x128xf32> to vector<2x128xf32>
    %c0_21 = arith.constant 0 : index
    %c896 = arith.constant 896 : index
    %60 = vector.load %arg3[%c0_21, %c896] : memref<128x1536xbf16, #tpu.memory_space<vmem>>, vector<128x640xbf16>
    %cst_22 = arith.constant dense<0.000000e+00> : vector<32x640xf32>
    %61 = tpu.matmul %11, %60, %cst_22 {dimension_numbers = #tpu.dot_dimension_numbers<[1], [0], [0], [1], [0, 0, 1, 1], [], []>} : vector<32x128xbf16>, vector<128x640xbf16>, vector<32x640xf32> -> vector<32x640xf32>
    %62 = vector.extract_strided_slice %61 {offsets = [0, 0], sizes = [32, 128], strides = [1, 1]} : vector<32x640xf32> to vector<32x128xf32>
    %c4_i32 = arith.constant 4 : i32
    %63 = tpu.dynamic_rotate %62 by %c4_i32 dim 0 : vector<32x128xf32>, i32 -> vector<32x128xf32>
    %64 = vector.extract_strided_slice %61 {offsets = [0, 128], sizes = [32, 128], strides = [1, 1]} : vector<32x640xf32> to vector<32x128xf32>
    %c3_i32_23 = arith.constant 3 : i32
    %65 = tpu.dynamic_rotate %64 by %c3_i32_23 dim 0 : vector<32x128xf32>, i32 -> vector<32x128xf32>
    %66 = arith.addf %63, %65 : vector<32x128xf32>
    %67 = vector.extract_strided_slice %61 {offsets = [0, 256], sizes = [32, 128], strides = [1, 1]} : vector<32x640xf32> to vector<32x128xf32>
    %c2_i32_24 = arith.constant 2 : i32
    %68 = tpu.dynamic_rotate %67 by %c2_i32_24 dim 0 : vector<32x128xf32>, i32 -> vector<32x128xf32>
    %69 = arith.addf %66, %68 : vector<32x128xf32>
    %70 = vector.extract_strided_slice %61 {offsets = [0, 384], sizes = [32, 128], strides = [1, 1]} : vector<32x640xf32> to vector<32x128xf32>
    %c1_i32_25 = arith.constant 1 : i32
    %71 = tpu.dynamic_rotate %70 by %c1_i32_25 dim 0 : vector<32x128xf32>, i32 -> vector<32x128xf32>
    %72 = arith.addf %69, %71 : vector<32x128xf32>
    %73 = vector.extract_strided_slice %61 {offsets = [0, 512], sizes = [32, 128], strides = [1, 1]} : vector<32x640xf32> to vector<32x128xf32>
    %74 = arith.addf %72, %73 : vector<32x128xf32>
    %c2 = arith.constant 2 : index
    %c0_26 = arith.constant 0 : index
    %75 = vector.load %arg4[%c2, %c0_26] : memref<3x128xf32, #tpu.memory_space<vmem>>, vector<1x128xf32>
    %76 = vector.broadcast %75 : vector<1x128xf32> to vector<32x128xf32>
    %77 = arith.addf %74, %76 : vector<32x128xf32>
    %cst_27 = arith.constant 0.000000e+00 : f32
    %78 = vector.broadcast %cst_27 : f32 to vector<32x128xf32>
    %79 = arith.maximumf %77, %78 : vector<32x128xf32>
    %80 = vector.shape_cast %79 : vector<32x128xf32> to vector<2x16x128xf32>
    %c4_i32_28 = arith.constant 4 : i32
    %81 = vector.broadcast %c4_i32_28 : i32 to vector<2x16x1xi32>
    %82 = arith.cmpi sge, %12, %81 : vector<2x16x1xi32>
    %cst_29 = arith.constant 0.000000e+00 : f32
    %83 = vector.shape_cast %82 : vector<2x16x1xi1> to vector<2x16x1xi1>
    %84 = vector.broadcast %83 : vector<2x16x1xi1> to vector<2x16x128xi1>
    %85 = vector.broadcast %cst_29 : f32 to vector<2x16x128xf32>
    %86 = arith.select %84, %80, %85 : vector<2x16x128xi1>, vector<2x16x128xf32>
    %cst_30 = arith.constant dense<0xFF800000> : vector<2x128xf32>
    %87 = vector.multi_reduction <maximumf>, %86, %cst_30 [1] : vector<2x16x128xf32> to vector<2x128xf32>
    %88 = tpu.concatenate %34, %59, %87 in 1 : vector<2x128xf32>, vector<2x128xf32>, vector<2x128xf32> -> vector<2x384xf32>
    %89 = arith.truncf %88 : vector<2x384xf32> to vector<2x384xbf16>
    %c0_31 = arith.constant 0 : index
    %c0_32 = arith.constant 0 : index
    %90 = vector.load %arg6[%c0_31, %c0_32] : memref<1x128xf32, #tpu.memory_space<vmem>>, vector<1x128xf32>
    %c0_33 = arith.constant 0 : index
    %c0_34 = arith.constant 0 : index
    %91 = vector.load %arg5[%c0_33, %c0_34] : memref<384x128xbf16, #tpu.memory_space<vmem>>, vector<384x128xbf16>
    %cst_35 = arith.constant dense<0.000000e+00> : vector<2x128xf32>
    %92 = tpu.matmul %89, %91, %cst_35 {dimension_numbers = #tpu.dot_dimension_numbers<[1], [0], [0], [1], [0, 0, 1, 1], [], []>} : vector<2x384xbf16>, vector<384x128xbf16>, vector<2x128xf32> -> vector<2x128xf32>
    %93 = vector.broadcast %90 : vector<1x128xf32> to vector<2x128xf32>
    %94 = arith.addf %93, %92 : vector<2x128xf32>
    %c0_36 = arith.constant 0 : index
    %c0_37 = arith.constant 0 : index
    %95 = vector.load %arg7[%c0_36, %c0_37] : memref<2x128xf32, #tpu.memory_space<vmem>>, vector<2x128xf32>
    tpu.vector_store %arg7[%c0_36, %c0_37], %94 {strides = array<i32>} : memref<2x128xf32, #tpu.memory_space<vmem>>, vector<2x128xf32>,
    return
  }
  func.func @transform_0(%arg0: i32) -> (i32, i32) {
    %c0_i32 = arith.constant 0 : i32
    %c0_i32_0 = arith.constant 0 : i32
    return %arg0, %c0_i32 : i32, i32
  }
  func.func @transform_1(%arg0: i32) -> (i32, i32) {
    %c0_i32 = arith.constant 0 : i32
    %c0_i32_0 = arith.constant 0 : i32
    %c0_i32_1 = arith.constant 0 : i32
    return %c0_i32, %c0_i32_0 : i32, i32
  }
  func.func @transform_2(%arg0: i32) -> (i32, i32) {
    %c0_i32 = arith.constant 0 : i32
    %c0_i32_0 = arith.constant 0 : i32
    %c0_i32_1 = arith.constant 0 : i32
    return %c0_i32, %c0_i32_0 : i32, i32
  }
  func.func @transform_3(%arg0: i32) -> (i32, i32) {
    %c0_i32 = arith.constant 0 : i32
    %c0_i32_0 = arith.constant 0 : i32
    %c0_i32_1 = arith.constant 0 : i32
    return %c0_i32, %c0_i32_0 : i32, i32
  }
  func.func @transform_4(%arg0: i32) -> (i32, i32) {
    %c0_i32 = arith.constant 0 : i32
    %c0_i32_0 = arith.constant 0 : i32
    %c0_i32_1 = arith.constant 0 : i32
    return %c0_i32, %c0_i32_0 : i32, i32
  }
  func.func @transform_5(%arg0: i32) -> (i32, i32) {
    %c0_i32 = arith.constant 0 : i32
    %c0_i32_0 = arith.constant 0 : i32
    %c0_i32_1 = arith.constant 0 : i32
    return %c0_i32, %c0_i32_0 : i32, i32
  }
  func.func @transform_6(%arg0: i32) -> (i32, i32) {
    %c0_i32 = arith.constant 0 : i32
    %c0_i32_0 = arith.constant 0 : i32
    return %arg0, %c0_i32 : i32, i32
  }
}

</mosaic_0001>

<bundles_post_ra>
// kernel: tpu_custom_call.1
= control target key start
LH: loop header
LB: loop body
LE: loop exit
PB: predicated region body
PF: predicated region fallthrough
CT: control target
= control target key end

     0   :  { %11 = vsyncpa [#allocation3], 0  ;;  %s2629_s0 = inlined_call_operand.hbm [shape: s32[2,16], index: 0, kind: input, shape index: {}]   ;;  %s2630_s1 = inlined_call_operand.hbm [shape: bf16[128,128], index: 1, kind: input, shape index: {}]   ;;  %s2631_s2 = inlined_call_operand.hbm [shape: bf16[128,1536], index: 2, kind: input, shape index: {}]   ;;  %s2632_s3 = inlined_call_operand.hbm [shape: f32[3,128], index: 3, kind: input, shape index: {}]   ;;  %s2633_s4 = inlined_call_operand.hbm [shape: bf16[384,128], index: 4, kind: input, shape index: {}]   ;;  %s2634_s5 = inlined_call_operand.vmem [shape: f32[1,128], index: 5, kind: input, shape index: {}]   ;;  %s2635_s6 = inlined_call_operand.hbm [shape: f32[2,128], index: 6, kind: output, shape index: {}]  }
   0x1   :  { %12 = vsyncpa [#allocation6], 0 }
   0x2   :  { %13 = vsyncpa [#allocation9], 0  ;;  %s30_s23 = sshll.u32 %s2630_s1, 4  ;;  %s31_s23 = int_to_ptr.hbm [resolvable:$true] %s30_s23 }
   0x3   :  { %14 = vsyncpa [#allocation4], 0  ;;  %s2380_s24 = smov [#allocation5]   ;;  %s57_s28 = sshll.u32 %s2632_s3, 4  ;;  %s58_s28 = int_to_ptr.hbm [resolvable:$true] %s57_s28 }
   0x4   :  { %s32_s25 = sshll.u32 %s2380_s24, 4  ;;  %s2381_s29 = smov 64   ;;  %s33_s25 = int_to_ptr.vmem [resolvable:$true] %s32_s25 }
   0x5   :  { %s2382_s30 = smov 4   ;;  %s2383_s7 = smov [#allocation8]  }
   0x6   :  { %38 = dma.hbm_to_vmem [thread:$0]  %s31_s23, 1024, %s33_s25, [#allocation6], %s2381_s29, %s2381_s29, %s2382_s30  }
   0x7   :  { %s59_s8 = sshll.u32 %s2383_s7, 4  ;;  %s20_s10 = sshll.u32 %s2629_s0, 4  ;;  %s60_s8 = int_to_ptr.vmem [resolvable:$true] %s59_s8  ;;  %s21_s10 = int_to_ptr.hbm [resolvable:$true] %s20_s10 }
   0x8   :  { %62 = dma.hbm_to_vmem [thread:$0]  %s58_s28, 64, %s60_s8, [#allocation9]  }
   0x9   :  { %s43_s3 = sshll.u32 %s2631_s2, 4  ;;  %s2384_s13 = smov [#allocation2]   ;;  %s44_s3 = int_to_ptr.hbm [resolvable:$true] %s43_s3 }
   0xa   :  { %s22_s14 = sshll.u32 %s2384_s13, 4  ;;  %s2385_s15 = smov [#allocation7]   ;;  %s23_s14 = int_to_ptr.vmem [resolvable:$true] %s22_s14 }
   0xb   :  { %25 = dma.hbm_to_vmem [thread:$0]  %s21_s10, 32, %s23_s14, [#allocation3]  }
   0xc   :  { %s45_s16 = sshll.u32 %s2385_s15, 4  ;;  %s2386_s17 = smov 768   ;;  %s46_s16 = int_to_ptr.vmem [resolvable:$true] %s45_s16 }
   0xd   :  { %s2387_s18 = smov 48   ;;  %s67_s20 = sshll.u32 %s2633_s4, 4  ;;  %s68_s20 = int_to_ptr.hbm [resolvable:$true] %s67_s20 }
   0xe   :  { %51 = dma.hbm_to_vmem [thread:$0]  %s44_s3, 12288, %s46_s16, [#allocation6], %s2386_s17, %s2386_s17, %s2387_s18  }
   0xf   :  { %s2388_s21 = smov [#allocation10]  }
  0x10   :  { %s69_s22 = sshll.u32 %s2388_s21, 4  ;;  %s70_s22 = int_to_ptr.vmem [resolvable:$true] %s69_s22 }
  0x11   :  { %75 = dma.hbm_to_vmem [thread:$0]  %s68_s20, 3072, %s70_s22, [#allocation9], %s2381_s29, %s2381_s29, %s2382_s30  }
  0x12   :  { %2372 = dma.done.wait [#allocation3], 32  }
  0x13   :  { %2373 = vsyncadd [#allocation3], 4294967264 }
  0x14   :  { %2374 = dma.done.wait [#allocation6], 13312  }
  0x15   :  { %2375 = vsyncadd [#allocation6], 4294953984 }
  0x16   :  { %2376 = dma.done.wait [#allocation9], 3136  }
  0x17   :  { %2377 = vsyncadd [#allocation9], 4294964160  ;;  %v99_v0 = vlaneseq  ;;  %v98_v2 = vld [vmem:[#allocation2] sm:$0x3]  ;;  %v2087_v6 = vld [vmem:[#allocation5 + $0x30] sm:$0xff]  ;;  %v2389_v16 = vmov 0.0  }
  0x18   :  { %v2088_v3 = vld [vmem:[#allocation5 + $0x38] sm:$0xff]  ;;  %v114_v4 = vperm.slane %v98_v2, 1  ;;  %v101_v5 = vperm.slane %v98_v2, 0  ;;  %v2086_v8 = vld [vmem:[#allocation5 + $0x28] sm:$0xff]  ;;  %v2085_v9 = vld [vmem:[#allocation5 + $0x20] sm:$0xff]  ;;  %vm1295_vm8 = vcmask 1041409  }
  0x19   :  { %v2447_v1 = vshrl.u32 %v99_v0, 7  ;;  %219 = vmatpush.bf16.msra.mxu0 %v2088_v3  ;;  %v2084_v10 = vld [vmem:[#allocation5 + $0x18] sm:$0xff]  ;;  %v2083_v11 = vld [vmem:[#allocation5 + $0x10] sm:$0xff]  ;;  %v2082_v12 = vld [vmem:[#allocation5 + $0x8] sm:$0xff]  ;;  %v2452_v14 = vand.u32 127, %v99_v0  ;;  %s2390_s23 = smov [#allocation11]  }
  0x1a   :  { %v2081_v13 = vld [vmem:[#allocation5] sm:$0xff]  ;;  %v2111_v19 = vld [vmem:[#allocation7 + $0x2cc] sm:$0xf0]  ;;  %v1689_v22 = vld [vmem:[#allocation7 + $0x2d0] sm:$0xf0]  ;;  %s1551_s24 = sshll.u32 %s2390_s23, 4  ;;  %s1552_s24 = int_to_ptr.vmem [resolvable:$true] %s1551_s24 }
  0x1b   :  { %2222 = vset.pattern.permute.xlu1 %v2447_v1  ;;  %2220 = vset.pattern.permute.xlu0 %v2447_v1  ;;  %v110_v7 = vadd.s32 8, %v2447_v1  ;;  %v1687_v18 = vld [vmem:[#allocation7 + $0x2a0] sm:$0xf]  ;;  %v2110_v20 = vld [vmem:[#allocation7 + $0x2a4] sm:$0xf]  ;;  %vm473_vm4 = vcmp.lt.s32.totalorder %v2447_v1, 1 }
  0x1c   :  { %v1688_v21 = vor.u32 %v2111_v19, %v1687_v18  ;;  %v1695_v23 = vld [vmem:[#allocation7 + $0x2a8] sm:$0xf]  ;;  %v2112_v24 = vld [vmem:[#allocation7 + $0x2d4] sm:$0xf0]  ;;  %v1692_v25 = vor.u32 %v2110_v20, %v1689_v22  ;;  %v1811_v27 = vld [vmem:[#allocation7 + $0x2ac] sm:$0xf] }
  0x1d   :  { %220 = vmatpush.bf16.msra.mxu0 %v2087_v6  ;;  %v1696_v26 = vor.u32 %v2112_v24, %v1695_v23  ;;  %v2143_v28 = vld [vmem:[#allocation7 + $0x2d8] sm:$0xf0]  ;;  %v1675_v29 = vld [vmem:[#allocation7 + $0x240] sm:$0xf]  ;;  %v2108_v32 = vld [vmem:[#allocation7 + $0x26c] sm:$0xf0] }
  0x1e   :  { %403 = vmatpush.bf16.msra.mxu1 %v1688_v21  ;;  %v1812_v31 = vor.u32 %v2143_v28, %v1811_v27  ;;  %v2107_v33 = vld [vmem:[#allocation7 + $0x244] sm:$0xf]  ;;  %v1677_v34 = vld [vmem:[#allocation7 + $0x270] sm:$0xf0]  ;;  %422 = vmatpush.bf16.msra.mxu2 %v1692_v25  ;;  %v1676_v35 = vor.u32 %v2108_v32, %v1675_v29  ;;  %v1683_v37 = vld [vmem:[#allocation7 + $0x248] sm:$0xf] }
  0x1f   :  { %441 = vmatpush.bf16.msra.mxu3 %v1696_v26  ;;  %v1680_v36 = vor.u32 %v2107_v33, %v1677_v34  ;;  %v2109_v38 = vld [vmem:[#allocation7 + $0x274] sm:$0xf0]  ;;  %v1795_v39 = vld [vmem:[#allocation7 + $0x24c] sm:$0xf]  ;;  %v2139_v41 = vld [vmem:[#allocation7 + $0x278] sm:$0xf0] }
  0x20   :  { %v1684_v40 = vor.u32 %v2109_v38, %v1683_v37  ;;  %v1663_v42 = vld [vmem:[#allocation7 + $0x1e0] sm:$0xf]  ;;  %v2105_v43 = vld [vmem:[#allocation7 + $0x20c] sm:$0xf0]  ;;  %v1796_v44 = vor.u32 %v2139_v41, %v1795_v39  ;;  %v2104_v45 = vld [vmem:[#allocation7 + $0x1e4] sm:$0xf] }
  0x21   :  { %221 = vmatpush.bf16.msra.mxu0 %v2086_v8  ;;  %v1665_v46 = vld [vmem:[#allocation7 + $0x210] sm:$0xf0]  ;;  %v1671_v47 = vld [vmem:[#allocation7 + $0x1e8] sm:$0xf]  ;;  %v1664_v50 = vor.u32 %v2105_v43, %v1663_v42  ;;  %v2106_v51 = vld [vmem:[#allocation7 + $0x214] sm:$0xf0] }
  0x22   :  { %404 = vmatpush.bf16.msra.mxu1 %v1676_v35  ;;  %v1779_v52 = vld [vmem:[#allocation7 + $0x1ec] sm:$0xf]  ;;  %v2135_v53 = vld [vmem:[#allocation7 + $0x218] sm:$0xf0]  ;;  %423 = vmatpush.bf16.msra.mxu2 %v1680_v36  ;;  %v1668_v54 = vor.u32 %v2104_v45, %v1665_v46  ;;  %v1672_v55 = vor.u32 %v2106_v51, %v1671_v47  ;;  %v1651_v56 = vld [vmem:[#allocation7 + $0x180] sm:$0xf] }
  0x23   :  { %119 = vperm.xlu1 %2222, %v114_v4   ;;  %106 = vperm.xlu0 %2220, %v101_v5   ;;  %v2102_v57 = vld [vmem:[#allocation7 + $0x1ac] sm:$0xf0]  ;;  %v2101_v58 = vld [vmem:[#allocation7 + $0x184] sm:$0xf]  ;;  %v1780_v60 = vor.u32 %v2135_v53, %v1779_v52  ;;  %v1653_v61 = vld [vmem:[#allocation7 + $0x1b0] sm:$0xf0] }
  0x24   :  { %442 = vmatpush.bf16.msra.mxu3 %v1684_v40  ;;  %v1659_v62 = vld [vmem:[#allocation7 + $0x188] sm:$0xf]  ;;  %v2103_v0 = vld [vmem:[#allocation7 + $0x1b4] sm:$0xf0]  ;;  %v1763_v2 = vld [vmem:[#allocation7 + $0x18c] sm:$0xf] }
  0x25   :  { %222 = vmatpush.bf16.msra.mxu0 %v2085_v9  ;;  %v2131_v3 = vld [vmem:[#allocation7 + $0x1b8] sm:$0xf0]  ;;  %v1639_v8 = vld [vmem:[#allocation7 + $0x120] sm:$0xf]  ;;  %v2099_v9 = vld [vmem:[#allocation7 + $0x14c] sm:$0xf0] }
  0x26   :  { %405 = vmatpush.bf16.msra.mxu1 %v1664_v50  ;;  %424 = vmatpush.bf16.msra.mxu2 %v1668_v54  ;;  %v2100_v19 = vld [vmem:[#allocation7 + $0x154] sm:$0xf0]  ;;  %v1747_v20 = vld [vmem:[#allocation7 + $0x12c] sm:$0xf]  ;;  %v2127_v21 = vld [vmem:[#allocation7 + $0x158] sm:$0xf0]  ;;  %v1640_v22 = vor.u32 %v2099_v9, %v1639_v8 }
  0x27   :  { %v1748_v25 = vor.u32 %v2127_v21, %v1747_v20  ;;  %v1627_v32 = vld [vmem:[#allocation7 + $0xc0] sm:$0xf]  ;;  %v2096_v33 = vld [vmem:[#allocation7 + $0xec] sm:$0xf0]  ;;  %v2095_v34 = vld [vmem:[#allocation7 + $0xc4] sm:$0xf] }
  0x28   :  { %443 = vmatpush.bf16.msra.mxu3 %v1672_v55  ;;  %v1628_v35 = vor.u32 %v2096_v33, %v1627_v32  ;;  %v1629_v36 = vld [vmem:[#allocation7 + $0xf0] sm:$0xf0]  ;;  %v1635_v37 = vld [vmem:[#allocation7 + $0xc8] sm:$0xf]  ;;  %v2097_v38 = vld [vmem:[#allocation7 + $0xf4] sm:$0xf0] }
  0x29   :  { %223 = vmatpush.bf16.msra.mxu0 %v2084_v10  ;;  %v1632_v39 = vor.u32 %v2095_v34, %v1629_v36  ;;  %v1636_v40 = vor.u32 %v2097_v38, %v1635_v37  ;;  %v2123_v41 = vld [vmem:[#allocation7 + $0xf8] sm:$0xf0]  ;;  %v1615_v43 = vld [vmem:[#allocation7 + $0x60] sm:$0xf]  ;;  %v2092_v45 = vld [vmem:[#allocation7 + $0x64] sm:$0xf] }
  0x2a   :  { %v1617_v47 = vld [vmem:[#allocation7 + $0x90] sm:$0xf0]  ;;  %v1715_v52 = vld [vmem:[#allocation7 + $0x6c] sm:$0xf]  ;;  %v2119_v53 = vld [vmem:[#allocation7 + $0x98] sm:$0xf0] }
  0x2b   :  { %2223 = vset.pattern.permute.xlu1 %v110_v7  ;;  %2221 = vset.pattern.permute.xlu0 %v110_v7  ;;  %v1656_v7 = vor.u32 %v2101_v58, %v1653_v61  ;;  %v1620_v50 = vor.u32 %v2092_v45, %v1617_v47  ;;  %v1716_v54 = vor.u32 %v2119_v53, %v1715_v52  ;;  %v1603_v55 = vld [vmem:[#allocation7] sm:$0xf]  ;;  %v2091_v61 = vld [vmem:[#allocation7 + $0x34] sm:$0xf0]  ;;  %v2137_v21 = vld [vmem:[#allocation7 + $0x250] sm:$0xf] }
  0x2c   :  { %v1813_v8 = vld [vmem:[#allocation7 + $0x2dc] sm:$0xf0]  ;;  %v2142_v9 = vld [vmem:[#allocation7 + $0x2b8] sm:$0xf]  ;;  %v1927_v38 = vld [vmem:[#allocation7 + $0x1fc] sm:$0xf] }
  0x2d   :  { %224 = vmatpush.bf16.msra.mxu0 %v2083_v11  ;;  %v1660_v11 = vor.u32 %v2103_v0, %v1659_v62  ;;  %425 = vmatpush.bf16.msra.mxu2 %v1656_v7  ;;  %v1699_v0 = vld [vmem:[#allocation7 + $0xc] sm:$0xf]  ;;  %v1781_v33 = vld [vmem:[#allocation7 + $0x21c] sm:$0xf0]  ;;  %v2134_v34 = vld [vmem:[#allocation7 + $0x1f8] sm:$0xf] }
  0x2e   :  { %v2130_v45 = vld [vmem:[#allocation7 + $0x198] sm:$0xf]  ;;  %v1773_v47 = vld [vmem:[#allocation7 + $0x1c4] sm:$0xf0]  ;;  %v1755_v52 = vld [vmem:[#allocation7 + $0x134] sm:$0xf] }
  0x2f   :  { %444 = vmatpush.bf16.msra.mxu3 %v1660_v11  ;;  %v2128_v53 = vld [vmem:[#allocation7 + $0x160] sm:$0xf0]  ;;  %vm464_vm5 = vcmp.lt.s32.totalorder %v2447_v1, 2  ;;  %vm496_vm6 = vcmp.ge.s32.totalorder %v2447_v1, 2  ;;  %vm792_vm7 = vcmp.lt.s32.totalorder %v2447_v1, 3  ;;  %vm835_vm9 = vcmp.ge.s32.totalorder %v2447_v1, 3 }
  0x30   :  { %vm1214_vm10 = vcmp.lt.s32.totalorder %v2447_v1, 4  ;;  %vm1269_vm11 = vcmp.ge.s32.totalorder %v2447_v1, 4  ;;  %s1553_s27 = sshll.u32 %s2635_s6, 4  ;;  %s1554_s27 = int_to_ptr.hbm [resolvable:$true] %s1553_s27 }
  0x31   :  { %225 = vmatpush.bf16.msra.mxu0 %v2082_v12  ;;  %v1764_v12 = vor.u32 %v2131_v3, %v1763_v2  ;;  %v2115_v2 = vld [vmem:[#allocation7 + $0x38] sm:$0xf0] }
  0x32   :  { %v1700_v3 = vor.u32 %v2115_v2, %v1699_v0  ;;  %v2124_v2 = vld [vmem:[#allocation7 + $0x100] sm:$0xf0] }
  0x33   :  { %125 = vperm.xlu1 %2223, %v114_v4   ;;  %112 = vperm.xlu0 %2221, %v101_v5   ;;  %v1652_v4 = vor.u32 %v2102_v57, %v1651_v56  ;;  %v2090_v56 = vld [vmem:[#allocation7 + $0x2c] sm:$0xf0]  ;;  %v2089_v57 = vld [vmem:[#allocation7 + $0x4] sm:$0xf] }
  0x34   :  { %v1604_v58 = vor.u32 %v2090_v56, %v1603_v55  ;;  %v1756_v55 = vor.u32 %v2128_v53, %v1755_v52  ;;  %v1749_v56 = vld [vmem:[#allocation7 + $0x15c] sm:$0xf0]  ;;  %v2178_v53 = vld [vmem:[#allocation7 + $0x290] sm:$0xf0] }
  0x35   :  { %226 = vmatpush.bf16.msra.mxu0 %v2081_v13  ;;  %v2098_v13 = vld [vmem:[#allocation7 + $0x124] sm:$0xf]  ;;  %406 = vmatpush.bf16.msra.mxu1 %v1652_v4  ;;  %v1819_v4 = vld [vmem:[#allocation7 + $0x2b4] sm:$0xf] }
  0x39   :  { %712 = vmatpush.bf16.msrb.mxu0 %v1812_v31  ;;  %407 = vmatpush.bf16.msra.mxu1 %v1640_v22  ;;  %v1797_v22 = vld [vmem:[#allocation7 + $0x27c] sm:$0xf0] }
  0x3d   :  { %713 = vmatpush.bf16.msrb.mxu0 %v1796_v44  ;;  %408 = vmatpush.bf16.msra.mxu1 %v1628_v35  ;;  %v2093_v44 = vld [vmem:[#allocation7 + $0x8c] sm:$0xf0]  ;;  %v1789_v35 = vld [vmem:[#allocation7 + $0x224] sm:$0xf0] }
  0x3e   :  { %v1616_v46 = vor.u32 %v2093_v44, %v1615_v43  ;;  %v1792_v37 = vor.u32 %v2134_v34, %v1789_v35  ;;  %v2129_v43 = vld [vmem:[#allocation7 + $0x190] sm:$0xf]  ;;  %v1765_v44 = vld [vmem:[#allocation7 + $0x1bc] sm:$0xf0] }
  0x41   :  { %714 = vmatpush.bf16.msrb.mxu0 %v1780_v60  ;;  %409 = vmatpush.bf16.msra.mxu1 %v1616_v46  ;;  %v1611_v60 = vld [vmem:[#allocation7 + $0x8] sm:$0xf]  ;;  %v1768_v46 = vor.u32 %v2129_v43, %v1765_v44  ;;  %v1969_v44 = vld [vmem:[#allocation7 + $0x2ec] sm:$0xf0] }
  0x45   :  { %715 = vmatpush.bf16.msrb.mxu0 %v1764_v12  ;;  %410 = vmatpush.bf16.msra.mxu1 %v1604_v58  ;;  %v1757_v58 = vld [vmem:[#allocation7 + $0x164] sm:$0xf0] }
  0x49   :  { %716 = vmatpush.bf16.msrb.mxu0 %v1748_v25  ;;  %v1805_v25 = vld [vmem:[#allocation7 + $0x284] sm:$0xf0] }
  0x95   :  { %v107_v15 = vpop.permute.xlu0 %106  ;;  %v2456_v30 = vpop.permute.xlu1 %119 }
  0x96   :  { %vm127_vm0 = vcmp.eq.s32.totalorder %v2452_v14, %v107_v15  ;;  %v1641_v15 = vld [vmem:[#allocation7 + $0x150] sm:$0xf0]  ;;  %vm129_vm2 = vcmp.eq.s32.totalorder %v2452_v14, %v2456_v30 }
  0x97   :  { %v1565_v17 = vsel %vm127_vm0, 1.0, %v2389_v16  ;;  %v1644_v23 = vor.u32 %v2098_v13, %v1641_v15  ;;  %v1567_v26 = vsel %vm129_vm2, 1.0, %v2389_v16  ;;  %v1967_v13 = vld [vmem:[#allocation7 + $0x2bc] sm:$0xf]  ;;  %v2182_v15 = vld [vmem:[#allocation7 + $0x2e8] sm:$0xf0] }
  0x98   :  { %v139_v48 = vpack.c.bf16 %v1565_v17, %v1565_v17  ;;  %v1647_v17 = vld [vmem:[#allocation7 + $0x128] sm:$0xf]  ;;  %v141_v28 = vpack.c.bf16 %v1567_v26, %v1567_v26  ;;  %v1947_v26 = vld [vmem:[#allocation7 + $0x25c] sm:$0xf] }
  0x99   :  { %v1648_v24 = vor.u32 %v2100_v19, %v1647_v17  ;;  %426 = vmatpush.bf16.msra.mxu2 %v1644_v23  ;;  %v1803_v17 = vld [vmem:[#allocation7 + $0x254] sm:$0xf]  ;;  %v2140_v19 = vld [vmem:[#allocation7 + $0x280] sm:$0xf0]  ;;  %v2138_v23 = vld [vmem:[#allocation7 + $0x258] sm:$0xf] }
  0x9a   :  { %v163_v5 = vunpack.c.l.b16 %v139_v48  ;;  %v165_v30 = vunpack.c.l.b16 %v141_v28  ;;  %v1623_v48 = vld [vmem:[#allocation7 + $0x68] sm:$0xf]  ;;  %v1804_v20 = vor.u32 %v2140_v19, %v1803_v17  ;;  %v1808_v28 = vor.u32 %v2138_v23, %v1805_v25  ;;  %v1717_v19 = vld [vmem:[#allocation7 + $0x9c] sm:$0xf0]  ;;  %v1847_v23 = vld [vmem:[#allocation7 + $0x7c] sm:$0xf] }
  0x9b   :  { %445 = vmatpush.bf16.msra.mxu3 %v1648_v24  ;;  %v1800_v24 = vor.u32 %v2137_v21, %v1797_v22  ;;  %v1725_v22 = vld [vmem:[#allocation7 + $0xa4] sm:$0xf0] }
  0x9d   :  { %427 = vmatpush.bf16.msra.mxu2 %v1632_v39  ;;  %v2172_v39 = vld [vmem:[#allocation7 + $0x228] sm:$0xf0] }
  0x9f   :  { %446 = vmatpush.bf16.msra.mxu3 %v1636_v40  ;;  %v1771_v40 = vld [vmem:[#allocation7 + $0x194] sm:$0xf] }
  0xa1   :  { %428 = vmatpush.bf16.msra.mxu2 %v1620_v50  ;;  %v1776_v50 = vor.u32 %v2130_v45, %v1773_v47  ;;  %v2181_v45 = vld [vmem:[#allocation7 + $0x2c8] sm:$0xf] }
  0xa5   :  { %v113_v49 = vpop.permute.xlu0 %112  ;;  %v126_v10 = vpop.permute.xlu1 %125 }
  0xa6   :  { %vm128_vm1 = vcmp.eq.s32.totalorder %v2452_v14, %v113_v49  ;;  %vm130_vm3 = vcmp.eq.s32.totalorder %v2452_v14, %v126_v10  ;;  %v2094_v49 = vld [vmem:[#allocation7 + $0x94] sm:$0xf0]  ;;  %v1821_v10 = vld [vmem:[#allocation7 + $0x2e4] sm:$0xf0] }
  0xa7   :  { %v1566_v59 = vsel %vm128_vm1, 1.0, %v2389_v16  ;;  %v1568_v27 = vsel %vm130_vm3, 1.0, %v2389_v16  ;;  %v1731_v16 = vld [vmem:[#allocation7 + $0xcc] sm:$0xf]  ;;  %v1624_v51 = vor.u32 %v2094_v49, %v1623_v48  ;;  %v1824_v12 = vor.u32 %v2142_v9, %v1821_v10  ;;  %v1907_v48 = vld [vmem:[#allocation7 + $0x19c] sm:$0xf] }
  0xa8   :  { %v140_v63 = vpack.c.bf16 %v1566_v59, %v1566_v59  ;;  %v142_v29 = vpack.c.bf16 %v1568_v27, %v1568_v27  ;;  %v1732_v42 = vor.u32 %v2123_v41, %v1731_v16  ;;  %v1605_v59 = vld [vmem:[#allocation7 + $0x30] sm:$0xf0]  ;;  %v2177_v27 = vld [vmem:[#allocation7 + $0x288] sm:$0xf0]  ;;  %v1928_v16 = vor.u32 %v2172_v39, %v1927_v38  ;;  %v2132_v41 = vld [vmem:[#allocation7 + $0x1c0] sm:$0xf0] }
  0xa9   :  { %447 = vmatpush.bf16.msra.mxu3 %v1624_v51  ;;  %v1608_v62 = vor.u32 %v2089_v57, %v1605_v59  ;;  %v2167_v49 = vld [vmem:[#allocation7 + $0x1c8] sm:$0xf0]  ;;  %v2126_v57 = vld [vmem:[#allocation7 + $0x138] sm:$0xf]  ;;  %v1867_v9 = vld [vmem:[#allocation7 + $0xdc] sm:$0xf] }
  0xaa   :  { %v164_v6 = vunpack.c.l.b16 %v140_v63  ;;  %v166_v31 = vunpack.c.l.b16 %v142_v29  ;;  %717 = vmatpush.bf16.msrb.mxu0 %v1732_v42  ;;  %v1612_v63 = vor.u32 %v2091_v61, %v1611_v60  ;;  %v1948_v29 = vor.u32 %v2177_v27, %v1947_v26  ;;  %v1887_v61 = vld [vmem:[#allocation7 + $0x13c] sm:$0xf]  ;;  %v1707_v27 = vld [vmem:[#allocation7 + $0x14] sm:$0xf] }
  0xab   :  { %429 = vmatpush.bf16.msra.mxu2 %v1608_v62  ;;  %v1772_v42 = vor.u32 %v2132_v41, %v1771_v40  ;;  %v1908_v51 = vor.u32 %v2167_v49, %v1907_v48  ;;  %v1760_v60 = vor.u32 %v2126_v57, %v1757_v58  ;;  %v2162_v62 = vld [vmem:[#allocation7 + $0x168] sm:$0xf0]  ;;  %v2183_v41 = vld [vmem:[#allocation7 + $0x2f0] sm:$0xf0]  ;;  %v2176_v58 = vld [vmem:[#allocation7 + $0x268] sm:$0xf] }
  0xac   :  { %v167_v18 = vpack.c.b16 %v164_v6, %v163_v5  ;;  %v168_v14 = vpack.c.b16 %v166_v31, %v165_v30  ;;  %v2144_v5 = vld [vmem:[#allocation7 + $0x2e0] sm:$0xf0]  ;;  %v2141_v6 = vld [vmem:[#allocation7 + $0x2b0] sm:$0xf]  ;;  %v1787_v30 = vld [vmem:[#allocation7 + $0x1f4] sm:$0xf]  ;;  %v1888_v0 = vor.u32 %v2162_v62, %v1887_v61 }
  0xad   :  { %448 = vmatpush.bf16.msra.mxu3 %v1612_v63  ;;  %v1820_v7 = vor.u32 %v2144_v5, %v1819_v4  ;;  %v1816_v11 = vor.u32 %v2141_v6, %v1813_v8  ;;  %v2136_v31 = vld [vmem:[#allocation7 + $0x220] sm:$0xf0]  ;;  %v1739_v63 = vld [vmem:[#allocation7 + $0xd4] sm:$0xf]  ;;  %v1733_v4 = vld [vmem:[#allocation7 + $0xfc] sm:$0xf0] }
  0xae   :  { %227 = vmatmul.bf16.vlgmr.msra.gmra.mxu0 %v167_v18  ;;  %v1968_v18 = vor.u32 %v2182_v15, %v1967_v13  ;;  %v1788_v32 = vor.u32 %v2136_v31, %v1787_v30  ;;  %v1740_v5 = vor.u32 %v2124_v2, %v1739_v63  ;;  %v1741_v8 = vld [vmem:[#allocation7 + $0x104] sm:$0xf0]  ;;  %v2120_v13 = vld [vmem:[#allocation7 + $0xa0] sm:$0xf0]  ;;  %v1701_v31 = vld [vmem:[#allocation7 + $0x3c] sm:$0xf0] }
  0xaf   :  { %718 = vmatpush.bf16.msrb.mxu0 %v1716_v54  ;;  %750 = vmatpush.bf16.msrb.mxu2 %v1820_v7  ;;  %v2125_v54 = vld [vmem:[#allocation7 + $0x130] sm:$0xf]  ;;  %v2122_v7 = vld [vmem:[#allocation7 + $0xd8] sm:$0xf]  ;;  %v1983_v49 = vld [vmem:[#allocation7 + $0x2cc] sm:$0xf] }
  0xb0   :  { %731 = vmatpush.bf16.msrb.mxu1 %v1816_v11  ;;  %v1752_v59 = vor.u32 %v2125_v54, %v1749_v56  ;;  %v1744_v10 = vor.u32 %v2122_v7, %v1741_v8  ;;  %v2157_v11 = vld [vmem:[#allocation7 + $0x108] sm:$0xf0]  ;;  %v2175_v54 = vld [vmem:[#allocation7 + $0x260] sm:$0xf]  ;;  %v2179_v62 = vld [vmem:[#allocation7 + $0x298] sm:$0xf0] }
  0xb1   :  { %769 = vmatpush.bf16.msrb.mxu3 %v1824_v12  ;;  %v1723_v12 = vld [vmem:[#allocation7 + $0x74] sm:$0xf]  ;;  %v1868_v17 = vor.u32 %v2157_v11, %v1867_v9  ;;  %v1935_v63 = vld [vmem:[#allocation7 + $0x204] sm:$0xf]  ;;  %v1937_v8 = vld [vmem:[#allocation7 + $0x234] sm:$0xf0] }
  0xb2   :  { %v1724_v21 = vor.u32 %v2120_v13, %v1723_v12  ;;  %v1943_v9 = vld [vmem:[#allocation7 + $0x20c] sm:$0xf]  ;;  %v1915_v13 = vld [vmem:[#allocation7 + $0x1a4] sm:$0xf] }
  0xb3   :  { %719 = vmatpush.bf16.msrb.mxu0 %v1700_v3  ;;  %751 = vmatpush.bf16.msrb.mxu2 %v1804_v20  ;;  %v2121_v3 = vld [vmem:[#allocation7 + $0xd0] sm:$0xf]  ;;  %v2118_v20 = vld [vmem:[#allocation7 + $0x78] sm:$0xf] }
  0xb4   :  { %732 = vmatpush.bf16.msrb.mxu1 %v1800_v24  ;;  %v1736_v6 = vor.u32 %v2121_v3, %v1733_v4  ;;  %v2152_v24 = vld [vmem:[#allocation7 + $0xa8] sm:$0xf0]  ;;  %v1728_v26 = vor.u32 %v2118_v20, %v1725_v22  ;;  %v2170_v4 = vld [vmem:[#allocation7 + $0x200] sm:$0xf]  ;;  %v2166_v20 = vld [vmem:[#allocation7 + $0x1a8] sm:$0xf] }
  0xb5   :  { %770 = vmatpush.bf16.msrb.mxu3 %v1808_v28  ;;  %v2116_v28 = vld [vmem:[#allocation7 + $0x40] sm:$0xf0]  ;;  %v1848_v30 = vor.u32 %v2152_v24, %v1847_v23 }
  0xb7   :  { %1115 = vmatpush.bf16.msra.mxu0 %v1968_v18  ;;  %752 = vmatpush.bf16.msrb.mxu2 %v1788_v32  ;;  %v2117_v18 = vld [vmem:[#allocation7 + $0x70] sm:$0xf]  ;;  %v1709_v32 = vld [vmem:[#allocation7 + $0x44] sm:$0xf0] }
  0xb8   :  { %v1720_v25 = vor.u32 %v2117_v18, %v1717_v19  ;;  %v1909_v19 = vld [vmem:[#allocation7 + $0x1cc] sm:$0xf0] }
  0xb9   :  { %771 = vmatpush.bf16.msrb.mxu3 %v1792_v37  ;;  %v2147_v37 = vld [vmem:[#allocation7 + $0x48] sm:$0xf0] }
  0xbb   :  { %1116 = vmatpush.bf16.msra.mxu0 %v1948_v29  ;;  %753 = vmatpush.bf16.msrb.mxu2 %v1772_v42  ;;  %v2113_v29 = vld [vmem:[#allocation7 + $0x10] sm:$0xf]  ;;  %v2180_v42 = vld [vmem:[#allocation7 + $0x2c0] sm:$0xf] }
  0xbc   :  { %v1704_v34 = vor.u32 %v2113_v29, %v1701_v31  ;;  %v1972_v47 = vor.u32 %v2180_v42, %v1969_v44  ;;  %v2163_v31 = vld [vmem:[#allocation7 + $0x170] sm:$0xf0]  ;;  %v1869_v44 = vld [vmem:[#allocation7 + $0x10c] sm:$0xf0] }
  0xbd   :  { %772 = vmatpush.bf16.msrb.mxu3 %v1776_v50  ;;  %v2184_v50 = vld [vmem:[#allocation7 + $0x2f8] sm:$0xf0]  ;;  %v2158_v42 = vld [vmem:[#allocation7 + $0x110] sm:$0xf0] }
  0xbe   :  { %232 = vmatmul.bf16.gmra.mxu0 %v168_v14  ;;  %v2133_v14 = vld [vmem:[#allocation7 + $0x1f0] sm:$0xf]  ;;  %v1984_v52 = vor.u32 %v2184_v50, %v1983_v49  ;;  %v1883_v49 = vld [vmem:[#allocation7 + $0xec] sm:$0xf] }
  0xbf   :  { %v1784_v36 = vor.u32 %v2133_v14, %v1781_v33  ;;  %1117 = vmatpush.bf16.msra.mxu0 %v1928_v16  ;;  %754 = vmatpush.bf16.msrb.mxu2 %v1756_v55  ;;  %v2114_v14 = vld [vmem:[#allocation7 + $0x18] sm:$0xf]  ;;  %v1708_v33 = vor.u32 %v2116_v28, %v1707_v27  ;;  %v1975_v16 = vld [vmem:[#allocation7 + $0x2c4] sm:$0xf]  ;;  %v1949_v55 = vld [vmem:[#allocation7 + $0x28c] sm:$0xf0] }
  0xc0   :  { %v1712_v35 = vor.u32 %v2114_v14, %v1709_v32  ;;  %v1976_v43 = vor.u32 %v2183_v41, %v1975_v16  ;;  %v1952_v57 = vor.u32 %v2175_v54, %v1949_v55  ;;  %v2160_v14 = vld [vmem:[#allocation7 + $0x140] sm:$0xf]  ;;  %v1875_v16 = vld [vmem:[#allocation7 + $0xe4] sm:$0xf]  ;;  %v1849_v55 = vld [vmem:[#allocation7 + $0xac] sm:$0xf0] }
  0xc1   :  { %733 = vmatpush.bf16.msrb.mxu1 %v1784_v36  ;;  %773 = vmatpush.bf16.msrb.mxu3 %v1760_v60  ;;  %v1827_v36 = vld [vmem:[#allocation7 + $0x1c] sm:$0xf]  ;;  %v1963_v60 = vld [vmem:[#allocation7 + $0x26c] sm:$0xf]  ;;  %v2150_v54 = vld [vmem:[#allocation7 + $0x80] sm:$0xf] }
  0xc2   :  { %v1828_v40 = vor.u32 %v2147_v37, %v1827_v36  ;;  %v1964_v3 = vor.u32 %v2179_v62, %v1963_v60  ;;  %v1863_v60 = vld [vmem:[#allocation7 + $0x8c] sm:$0xf]  ;;  %v1852_v62 = vor.u32 %v2150_v54, %v1849_v55 }
  0xc3   :  { %1118 = vmatpush.bf16.msra.mxu0 %v1908_v51  ;;  %755 = vmatpush.bf16.msrb.mxu2 %v1740_v5  ;;  %v1955_v51 = vld [vmem:[#allocation7 + $0x264] sm:$0xf]  ;;  %v1929_v5 = vld [vmem:[#allocation7 + $0x22c] sm:$0xf0] }
  0xc4   :  { %v1956_v56 = vor.u32 %v2178_v53, %v1955_v51  ;;  %v1932_v11 = vor.u32 %v2170_v4, %v1929_v5  ;;  %v2159_v51 = vld [vmem:[#allocation7 + $0x118] sm:$0xf0]  ;;  %v2153_v53 = vld [vmem:[#allocation7 + $0xb0] sm:$0xf0]  ;;  %v1829_v4 = vld [vmem:[#allocation7 + $0x4c] sm:$0xf0] }
  0xc5   :  { %734 = vmatpush.bf16.msrb.mxu1 %v1768_v46  ;;  %774 = vmatpush.bf16.msrb.mxu3 %v1744_v10  ;;  %v1977_v46 = vld [vmem:[#allocation7 + $0x2f4] sm:$0xf0]  ;;  %v2174_v10 = vld [vmem:[#allocation7 + $0x238] sm:$0xf0]  ;;  %v2146_v5 = vld [vmem:[#allocation7 + $0x28] sm:$0xf] }
  0xc6   :  { %v1980_v48 = vor.u32 %v2181_v45, %v1977_v46  ;;  %v1944_v18 = vor.u32 %v2174_v10, %v1943_v9  ;;  %v1876_v45 = vor.u32 %v2158_v42, %v1875_v16 }
  0xc7   :  { %1119 = vmatpush.bf16.msra.mxu0 %v1888_v0  ;;  %756 = vmatpush.bf16.msrb.mxu2 %v1724_v21  ;;  %v2173_v0 = vld [vmem:[#allocation7 + $0x230] sm:$0xf0]  ;;  %v1917_v21 = vld [vmem:[#allocation7 + $0x1d4] sm:$0xf0] }
  0xc8   :  { %v1936_v7 = vor.u32 %v2173_v0, %v1935_v63  ;;  %v1920_v24 = vor.u32 %v2166_v20, %v1917_v21  ;;  %v1835_v0 = vld [vmem:[#allocation7 + $0x24] sm:$0xf]  ;;  %v2190_v20 = vld [vmem:[#allocation10 + $0x28] sm:$0xff] }
  0xc9   :  { %735 = vmatpush.bf16.msrb.mxu1 %v1752_v59  ;;  %775 = vmatpush.bf16.msrb.mxu3 %v1728_v26  ;;  %v1957_v59 = vld [vmem:[#allocation7 + $0x294] sm:$0xf0]  ;;  %v2169_v26 = vld [vmem:[#allocation7 + $0x1d8] sm:$0xf0] }
  0xca   :  { %v1960_v61 = vor.u32 %v2176_v58, %v1957_v59  ;;  %v1857_v59 = vld [vmem:[#allocation7 + $0xb4] sm:$0xf0] }
  0xcb   :  { %1120 = vmatpush.bf16.msra.mxu0 %v1868_v17  ;;  %757 = vmatpush.bf16.msrb.mxu2 %v1708_v33  ;;  %v2165_v17 = vld [vmem:[#allocation7 + $0x1a0] sm:$0xf]  ;;  %v1889_v33 = vld [vmem:[#allocation7 + $0x16c] sm:$0xf0] }
  0xcc   :  { %v1912_v23 = vor.u32 %v2165_v17, %v1909_v19  ;;  %v1892_v36 = vor.u32 %v2160_v14, %v1889_v33 }
  0xcd   :  { %736 = vmatpush.bf16.msrb.mxu1 %v1736_v6  ;;  %776 = vmatpush.bf16.msrb.mxu3 %v1712_v35  ;;  %v2171_v6 = vld [vmem:[#allocation7 + $0x208] sm:$0xf]  ;;  %v1897_v35 = vld [vmem:[#allocation7 + $0x174] sm:$0xf0] }
  0xce   :  { %v1940_v12 = vor.u32 %v2171_v6, %v1937_v8  ;;  %v1837_v6 = vld [vmem:[#allocation7 + $0x54] sm:$0xf0] }
  0xcf   :  { %1121 = vmatpush.bf16.msra.mxu0 %v1848_v30  ;;  %v1895_v30 = vld [vmem:[#allocation7 + $0x144] sm:$0xf]  ;;  %v1840_v10 = vor.u32 %v2146_v5, %v1837_v6  ;;  %v2198_v5 = vld [vmem:[#allocation10 + $0x68] sm:$0xff] }
  0xd0   :  { %v1896_v32 = vor.u32 %v2163_v31, %v1895_v30  ;;  %v2186_v31 = vld [vmem:[#allocation10 + $0x8] sm:$0xff] }
  0xd1   :  { %737 = vmatpush.bf16.msrb.mxu1 %v1720_v25  ;;  %v1923_v25 = vld [vmem:[#allocation7 + $0x1ac] sm:$0xf] }
  0xd2   :  { %v1924_v29 = vor.u32 %v2169_v26, %v1923_v25  ;;  %v2188_v25 = vld [vmem:[#allocation10 + $0x18] sm:$0xff] }
  0xd3   :  { %1122 = vmatpush.bf16.msra.mxu0 %v1828_v40  ;;  %v2164_v40 = vld [vmem:[#allocation7 + $0x178] sm:$0xf0] }
  0xd5   :  { %738 = vmatpush.bf16.msrb.mxu1 %v1704_v34  ;;  %v2161_v34 = vld [vmem:[#allocation7 + $0x148] sm:$0xf] }
  0xd6   :  { %v1900_v37 = vor.u32 %v2161_v34, %v1897_v35 }
 0x12b   :  { %v228_v15 = vpop.f32.mrf.mxu0 }
 0x133   :  { %v230_v38 = vpop.f32.mrf.mxu0 }
 0x134   :  { %v2465_v39 = vpack.c.bf16 %v230_v38, %v228_v15  ;;  %v2168_v15 = vld [vmem:[#allocation7 + $0x1d0] sm:$0xf0]  ;;  %v1903_v38 = vld [vmem:[#allocation7 + $0x14c] sm:$0xf] }
 0x135   :  { %v1916_v22 = vor.u32 %v2168_v15, %v1915_v13  ;;  %v1904_v41 = vor.u32 %v2164_v40, %v1903_v38  ;;  %v2192_v15 = vld [vmem:[#allocation10 + $0x38] sm:$0xff]  ;;  %v2185_v40 = vld [vmem:[#allocation10] sm:$0xff] }
 0x136   :  { %411 = vmatmul.bf16.vlgmr.msra.gmra.mxu1 %v2465_v39  ;;  %430 = vmatmul.bf16.vlgmr.msra.gmra.mxu2 %v2465_v39 }
 0x137   :  { %449 = vmatmul.bf16.vlgmr.msra.gmra.mxu3 %v2465_v39  ;;  %720 = vmatmul.bf16.vlgmr.msrb.gmra.mxu0 %v2465_v39 }
 0x138   :  { %1153 = vmatpush.bf16.msra.mxu2 %v1976_v43  ;;  %1134 = vmatpush.bf16.msra.mxu1 %v1972_v47  ;;  %v2155_v43 = vld [vmem:[#allocation7 + $0xe0] sm:$0xf]  ;;  %v2156_v47 = vld [vmem:[#allocation7 + $0xe8] sm:$0xf] }
 0x139   :  { %1172 = vmatpush.bf16.msra.mxu3 %v1980_v48  ;;  %1191 = vmatpush.bf16.msrb.mxu0 %v1984_v52  ;;  %v1872_v46 = vor.u32 %v2155_v43, %v1869_v44  ;;  %v1877_v48 = vld [vmem:[#allocation7 + $0x114] sm:$0xf0]  ;;  %v1855_v52 = vld [vmem:[#allocation7 + $0x84] sm:$0xf] }
 0x13a   :  { %v1880_v50 = vor.u32 %v2156_v47, %v1877_v48  ;;  %v1856_v58 = vor.u32 %v2153_v53, %v1855_v52  ;;  %v2224_v52 = vld [vmem:[#allocation8] ss:$0 sm:$0xff] }
 0x13b   :  { %v233_v2 = vpop.f32.mrf.mxu0 }
 0x13c   :  { %1154 = vmatpush.bf16.msra.mxu2 %v1956_v56  ;;  %1135 = vmatpush.bf16.msra.mxu1 %v1952_v57  ;;  %v2151_v56 = vld [vmem:[#allocation7 + $0x88] sm:$0xf]  ;;  %v1884_v57 = vor.u32 %v2159_v51, %v1883_v49  ;;  %v2200_v49 = vld [vmem:[#allocation10 + $0x78] sm:$0xff] }
 0x13d   :  { %1173 = vmatpush.bf16.msra.mxu3 %v1960_v61  ;;  %1192 = vmatpush.bf16.msrb.mxu0 %v1964_v3  ;;  %v2154_v61 = vld [vmem:[#allocation7 + $0xb8] sm:$0xf0]  ;;  %v1860_v63 = vor.u32 %v2151_v56, %v1857_v59  ;;  %v2145_v3 = vld [vmem:[#allocation7 + $0x20] sm:$0xf] }
 0x13e   :  { %v1832_v9 = vor.u32 %v2145_v3, %v1829_v4 }
 0x140   :  { %1155 = vmatpush.bf16.msra.mxu2 %v1936_v7  ;;  %1136 = vmatpush.bf16.msra.mxu1 %v1932_v11  ;;  %v1864_v7 = vor.u32 %v2154_v61, %v1863_v60  ;;  %v1843_v11 = vld [vmem:[#allocation7 + $0x2c] sm:$0xf] }
 0x141   :  { %1174 = vmatpush.bf16.msra.mxu3 %v1940_v12  ;;  %1193 = vmatpush.bf16.msrb.mxu0 %v1944_v18  ;;  %v2149_v12 = vld [vmem:[#allocation7 + $0x58] sm:$0xf0]  ;;  %v2191_v18 = vld [vmem:[#allocation10 + $0x30] sm:$0xff] }
 0x142   :  { %v1844_v13 = vor.u32 %v2149_v12, %v1843_v11 }
 0x143   :  { %v235_v27 = vpop.f32.mrf.mxu0 }
 0x144   :  { %v2471_v28 = vpack.c.bf16 %v235_v27, %v233_v2  ;;  %1156 = vmatpush.bf16.msra.mxu2 %v1916_v22  ;;  %1137 = vmatpush.bf16.msra.mxu1 %v1912_v23  ;;  %v2148_v2 = vld [vmem:[#allocation7 + $0x50] sm:$0xf0]  ;;  %v2189_v23 = vld [vmem:[#allocation10 + $0x20] sm:$0xff] }
 0x145   :  { %1175 = vmatpush.bf16.msra.mxu3 %v1920_v24  ;;  %1194 = vmatpush.bf16.msrb.mxu0 %v1924_v29  ;;  %v1836_v8 = vor.u32 %v2148_v2, %v1835_v0  ;;  %v2187_v29 = vld [vmem:[#allocation10 + $0x10] sm:$0xff] }
 0x146   :  { %416 = vmatmul.bf16.gmra.mxu1 %v2471_v28  ;;  %435 = vmatmul.bf16.gmra.mxu2 %v2471_v28 }
 0x147   :  { %454 = vmatmul.bf16.gmra.mxu3 %v2471_v28  ;;  %725 = vmatmul.bf16.gmra.mxu0 %v2471_v28 }
 0x148   :  { %1157 = vmatpush.bf16.msra.mxu2 %v1896_v32  ;;  %1138 = vmatpush.bf16.msra.mxu1 %v1892_v36 }
 0x149   :  { %1176 = vmatpush.bf16.msra.mxu3 %v1900_v37  ;;  %1195 = vmatpush.bf16.msrb.mxu0 %v1904_v41 }
 0x14c   :  { %1158 = vmatpush.bf16.msra.mxu2 %v1876_v45  ;;  %1139 = vmatpush.bf16.msra.mxu1 %v1872_v46 }
 0x14d   :  { %1177 = vmatpush.bf16.msra.mxu3 %v1880_v50  ;;  %1196 = vmatpush.bf16.msrb.mxu0 %v1884_v57 }
 0x150   :  { %1159 = vmatpush.bf16.msra.mxu2 %v1856_v58  ;;  %1140 = vmatpush.bf16.msra.mxu1 %v1852_v62  ;;  %v2199_v58 = vld [vmem:[#allocation10 + $0x70] sm:$0xff] }
 0x151   :  { %1178 = vmatpush.bf16.msra.mxu3 %v1860_v63  ;;  %1197 = vmatpush.bf16.msrb.mxu0 %v1864_v7 }
 0x154   :  { %1160 = vmatpush.bf16.msra.mxu2 %v1836_v8  ;;  %1141 = vmatpush.bf16.msra.mxu1 %v1832_v9 }
 0x155   :  { %1179 = vmatpush.bf16.msra.mxu3 %v1840_v10  ;;  %1198 = vmatpush.bf16.msrb.mxu0 %v1844_v13 }
 0x156   :  { %739 = vmatmul.bf16.vlgmr.msrb.gmra.mxu1 %v2465_v39  ;;  %758 = vmatmul.bf16.vlgmr.msrb.gmra.mxu2 %v2465_v39 }
 0x157   :  { %777 = vmatmul.bf16.vlgmr.msrb.gmra.mxu3 %v2465_v39  ;;  %1123 = vmatmul.bf16.vlgmr.msra.gmra.mxu0 %v2465_v39 }
 0x158   :  { %1502 = vmatpush.bf16.msrb.mxu1 %v2192_v15  ;;  %1515 = vmatpush.bf16.msrb.mxu2 %v2200_v49 }
 0x15c   :  { %1503 = vmatpush.bf16.msrb.mxu1 %v2191_v18  ;;  %1516 = vmatpush.bf16.msrb.mxu2 %v2199_v58 }
 0x160   :  { %1504 = vmatpush.bf16.msrb.mxu1 %v2190_v20  ;;  %1517 = vmatpush.bf16.msrb.mxu2 %v2198_v5 }
 0x164   :  { %1505 = vmatpush.bf16.msrb.mxu1 %v2189_v23 }
 0x166   :  { %744 = vmatmul.bf16.gmra.mxu1 %v2471_v28  ;;  %763 = vmatmul.bf16.gmra.mxu2 %v2471_v28 }
 0x167   :  { %782 = vmatmul.bf16.gmra.mxu3 %v2471_v28  ;;  %1128 = vmatmul.bf16.gmra.mxu0 %v2471_v28 }
 0x168   :  { %1506 = vmatpush.bf16.msrb.mxu1 %v2188_v25 }
 0x16c   :  { %1507 = vmatpush.bf16.msrb.mxu1 %v2187_v29 }
 0x170   :  { %1508 = vmatpush.bf16.msrb.mxu1 %v2186_v31 }
 0x174   :  { %1509 = vmatpush.bf16.msrb.mxu1 %v2185_v40 }
 0x176   :  { %1142 = vmatmul.bf16.vlgmr.msra.gmra.mxu1 %v2465_v39  ;;  %1161 = vmatmul.bf16.vlgmr.msra.gmra.mxu2 %v2465_v39 }
 0x177   :  { %1180 = vmatmul.bf16.vlgmr.msra.gmra.mxu3 %v2465_v39  ;;  %1199 = vmatmul.bf16.vlgmr.msrb.gmra.mxu0 %v2465_v39 }
 0x186   :  { %1147 = vmatmul.bf16.gmra.mxu1 %v2471_v28  ;;  %1166 = vmatmul.bf16.gmra.mxu2 %v2471_v28 }
 0x187   :  { %1185 = vmatmul.bf16.gmra.mxu3 %v2471_v28  ;;  %1204 = vmatmul.bf16.gmra.mxu0 %v2471_v28 }
 0x1b3   :  { %v412_v17 = vpop.f32.mrf.mxu1 }
 0x1b4   :  { %v2493_v19 = vpop.f32.mrf.mxu0  ;;  %v460_v16 = vrot.slane %v412_v17, 6  ;;  %v2197_v17 = vld [vmem:[#allocation10 + $0x60] sm:$0xff] }
 0x1b5   :  { %1518 = vmatpush.bf16.msrb.mxu2 %v2197_v17 }
 0x1b9   :  { %v431_v21 = vpop.f32.mrf.mxu2 }
 0x1ba   :  { %v450_v22 = vpop.f32.mrf.mxu3  ;;  %v469_v34 = vrot.slane %v431_v21, 7 }
 0x1bb   :  { %v414_v39 = vpop.f32.mrf.mxu1 }
 0x1bc   :  { %v2495_v24 = vpop.f32.mrf.mxu0  ;;  %v461_v35 = vrot.slane %v414_v39, 6 }
 0x1be   :  { %v467_v46 = vsel %vm464_vm5, %v460_v16, %v461_v35 }
 0x1c1   :  { %v433_v26 = vpop.f32.mrf.mxu2 }
 0x1c2   :  { %v452_v27 = vpop.f32.mrf.mxu3  ;;  %v470_v14 = vrot.slane %v433_v26, 7  ;;  %v2196_v26 = vld [vmem:[#allocation10 + $0x58] sm:$0xff] }
 0x1c3   :  { %v417_v28 = vpop.f32.mrf.mxu1  ;;  %1519 = vmatpush.bf16.msrb.mxu2 %v2196_v26 }
 0x1c4   :  { %v2497_v30 = vpop.f32.mrf.mxu0  ;;  %v462_v32 = vrot.slane %v417_v28, 6  ;;  %v476_v41 = vsel %vm473_vm4, %v469_v34, %v470_v14 }
 0x1c5   :  { %v479_v47 = vadd.f32 %v476_v41, %v467_v46 }
 0x1c6   :  { %v466_v42 = vsel %vm464_vm5, %v461_v35, %v462_v32 }
 0x1c7   :  { %v483_v55 = vadd.f32 %v479_v47, %v452_v27 }
 0x1c9   :  { %v436_v33 = vpop.f32.mrf.mxu2  ;;  %v489_v6 = vadd.f32 %v2224_v52, %v483_v55 }
 0x1ca   :  { %v471_v36 = vrot.slane %v436_v33, 7  ;;  %v455_v37 = vpop.f32.mrf.mxu3 }
 0x1cb   :  { %v419_v38 = vpop.f32.mrf.mxu1  ;;  %v493_v18 = vmax.f32 %v489_v6, 0.0 }
 0x1cc   :  { %v475_v43 = vsel %vm473_vm4, %v470_v14, %v471_v36  ;;  %v2507_v44 = vpop.f32.mrf.mxu0  ;;  %v463_v48 = vrot.slane %v419_v38, 6  ;;  %v790_v38 = vrot.slane %v2497_v30, 5 }
 0x1cd   :  { %v480_v45 = vadd.f32 %v475_v43, %v466_v42  ;;  %v2194_v43 = vld [vmem:[#allocation10 + $0x48] sm:$0xff] }
 0x1ce   :  { %v468_v56 = vsel %vm464_vm5, %v463_v48, %v460_v16  ;;  %v465_v61 = vsel %vm464_vm5, %v462_v32, %v463_v48 }
 0x1cf   :  { %v484_v50 = vadd.f32 %v480_v45, %v455_v37  ;;  %v789_v45 = vrot.slane %v2495_v24, 5  ;;  %v788_v24 = vrot.slane %v2493_v19, 5 }
 0x1d1   :  { %v438_v51 = vpop.f32.mrf.mxu2  ;;  %v490_v59 = vadd.f32 %v2224_v52, %v484_v50  ;;  %v794_v30 = vsel %vm792_vm7, %v789_v45, %v790_v38 }
 0x1d2   :  { %v472_v53 = vrot.slane %v438_v51, 7  ;;  %v457_v54 = vpop.f32.mrf.mxu3 }
 0x1d3   :  { %v2513_v57 = vpop.f32.mrf.mxu1  ;;  %v494_v7 = vmax.f32 %v490_v59, 0.0 }
 0x1d4   :  { %v477_v60 = vsel %vm473_vm4, %v472_v53, %v469_v34  ;;  %v474_v62 = vsel %vm473_vm4, %v471_v36, %v472_v53  ;;  %v2521_v63 = vpop.f32.mrf.mxu0  ;;  %v2195_v34 = vld [vmem:[#allocation10 + $0x50] sm:$0xff]  ;;  %v797_v49 = vrot.slane %v2513_v57, 6  ;;  %v2193_v57 = vld [vmem:[#allocation10 + $0x40] sm:$0xff] }
 0x1d5   :  { %v478_v0 = vadd.f32 %v477_v60, %v468_v56  ;;  %v481_v2 = vadd.f32 %v474_v62, %v465_v61  ;;  %v504_v20 = vsel %vm496_vm6, %v494_v7, 0.0  ;;  %1520 = vmatpush.bf16.msrb.mxu2 %v2195_v34 }
 0x1d7   :  { %v482_v3 = vadd.f32 %v478_v0, %v450_v22  ;;  %v485_v4 = vadd.f32 %v481_v2, %v457_v54  ;;  %v795_v0 = vsel %vm792_vm7, %v788_v24, %v789_v45 }
 0x1d9   :  { %v488_v8 = vadd.f32 %v2224_v52, %v482_v3  ;;  %v491_v9 = vadd.f32 %v2224_v52, %v485_v4  ;;  %v2524_v10 = vpop.f32.mrf.mxu2  ;;  %1521 = vmatpush.bf16.msrb.mxu2 %v2194_v43  ;;  %v791_v4 = vrot.slane %v2507_v44, 5  ;;  %v2225_v44 = vld [vmem:[#allocation8 + $0x1] ss:$0 sm:$0xff] }
 0x1da   :  { %v2526_v11 = vpop.f32.mrf.mxu3  ;;  %v809_v55 = vrot.slane %v2524_v10, 7 }
 0x1db   :  { %v492_v12 = vmax.f32 %v488_v8, 0.0  ;;  %v495_v13 = vmax.f32 %v491_v9, 0.0  ;;  %v742_v15 = vpop.f32.mrf.mxu1 }
 0x1dc   :  { %v2528_v21 = vpop.f32.mrf.mxu0  ;;  %v798_v40 = vrot.slane %v742_v15, 6  ;;  %v796_v15 = vsel %vm792_vm7, %v791_v4, %v788_v24 }
 0x1dd   :  { %v502_v22 = vsel %vm496_vm6, %v492_v12, 0.0  ;;  %v513_v39 = vmax.f32 %v504_v20, %v495_v13  ;;  %1522 = vmatpush.bf16.msrb.mxu2 %v2193_v57  ;;  %v793_v13 = vsel %vm792_vm7, %v790_v38, %v791_v4  ;;  %v2208_v20 = vld [vmem:[#allocation10 + $0xb8] sm:$0xff] }
 0x1de   :  { %v506_v23 = vmax.f32 %v502_v22, %v493_v18  ;;  %v803_v56 = vsel %vm464_vm5, %v797_v49, %v798_v40  ;;  %1528 = vmatpush.bf16.msrb.mxu3 %v2208_v20 }
 0x1df   :  { %v514_v25 = vrot.slane %v513_v39, 4  ;;  %v806_v5 = vadd.f32 %v803_v56, %v795_v0  ;;  %v2204_v56 = vld [vmem:[#allocation10 + $0x98] sm:$0xff]  ;;  %v2203_v0 = vld [vmem:[#allocation10 + $0x90] sm:$0xff] }
 0x1e0   :  { %v507_v27 = vrot.slane %v506_v23, 4 }
 0x1e1   :  { %v515_v28 = vmax.f32 %v513_v39, %v514_v25  ;;  %v761_v29 = vpop.f32.mrf.mxu2 }
 0x1e2   :  { %v508_v31 = vmax.f32 %v506_v23, %v507_v27  ;;  %v780_v14 = vpop.f32.mrf.mxu3  ;;  %v810_v50 = vrot.slane %v761_v29, 7 }
 0x1e3   :  { %v516_v32 = vrot.slane %v515_v28, 2  ;;  %v745_v33 = vpop.f32.mrf.mxu1 }
 0x1e4   :  { %v799_v35 = vrot.slane %v745_v33, 6  ;;  %v509_v36 = vrot.slane %v508_v31, 2  ;;  %v2531_v16 = vpop.f32.mrf.mxu0  ;;  %v815_v19 = vsel %vm473_vm4, %v809_v55, %v810_v50 }
 0x1e5   :  { %v517_v37 = vmax.f32 %v515_v28, %v516_v32  ;;  %v818_v6 = vadd.f32 %v815_v19, %v806_v5  ;;  %v2207_v32 = vld [vmem:[#allocation10 + $0xb0] sm:$0xff] }
 0x1e6   :  { %v510_v41 = vmax.f32 %v508_v31, %v509_v36  ;;  %v802_v46 = vsel %vm464_vm5, %v798_v40, %v799_v35  ;;  %1529 = vmatpush.bf16.msrb.mxu3 %v2207_v32 }
 0x1e7   :  { %v518_v42 = vrot.slane %v517_v37, 1  ;;  %v807_v58 = vadd.f32 %v802_v46, %v794_v30  ;;  %v822_v25 = vadd.f32 %v818_v6, %v780_v14 }
 0x1e8   :  { %v511_v47 = vrot.slane %v510_v41, 1 }
 0x1e9   :  { %v519_v48 = vmax.f32 %v517_v37, %v518_v42  ;;  %v764_v51 = vpop.f32.mrf.mxu2  ;;  %v2206_v42 = vld [vmem:[#allocation10 + $0xa8] sm:$0xff] }
 0x1ea   :  { %v811_v52 = vrot.slane %v764_v51, 7  ;;  %v783_v53 = vpop.f32.mrf.mxu3  ;;  %v512_v54 = vmax.f32 %v510_v41, %v511_v47  ;;  %1530 = vmatpush.bf16.msrb.mxu3 %v2206_v42  ;;  %v2205_v51 = vld [vmem:[#allocation10 + $0xa0] sm:$0xff] }
 0x1eb   :  { %v747_v59 = vpop.f32.mrf.mxu1 }
 0x1ec   :  { %v814_v60 = vsel %vm473_vm4, %v810_v50, %v811_v52  ;;  %v800_v61 = vrot.slane %v747_v59, 6  ;;  %v1296_v62 = vsel %vm1295_vm8, %v519_v48, %v512_v54  ;;  %v2556_v10 = vpop.f32.mrf.mxu0 }
 0x1ed   :  { %v819_v2 = vadd.f32 %v814_v60, %v807_v58  ;;  %v1306_v3 = vpack.c.bf16 %v1296_v62, %v1296_v62 }
 0x1ee   :  { %v801_v8 = vsel %vm464_vm5, %v799_v35, %v800_v61  ;;  %v804_v9 = vsel %vm464_vm5, %v800_v61, %v797_v49  ;;  %v828_v35 = vadd.f32 %v2225_v44, %v822_v25  ;;  %1531 = vmatpush.bf16.msrb.mxu3 %v2205_v51 }
 0x1ef   :  { %1510 = vmatmul.bf16.vlgmr.msrb.gmra.mxu1 %v1306_v3  ;;  %v823_v7 = vadd.f32 %v819_v2, %v783_v53  ;;  %v805_v22 = vadd.f32 %v804_v9, %v796_v15  ;;  %v808_v39 = vadd.f32 %v801_v8, %v793_v13  ;;  %v1211_v2 = vrot.slane %v2528_v21, 4  ;;  %v2202_v21 = vld [vmem:[#allocation10 + $0x88] sm:$0xff] }
 0x1f0   :  { %v832_v47 = vmax.f32 %v828_v35, 0.0  ;;  %v1212_v3 = vrot.slane %v2531_v16, 4  ;;  %v1210_v8 = vrot.slane %v2521_v63, 4 }
 0x1f1   :  { %v766_v12 = vpop.f32.mrf.mxu2  ;;  %v829_v26 = vadd.f32 %v2225_v44, %v823_v7 }
 0x1f2   :  { %v812_v17 = vrot.slane %v766_v12, 7  ;;  %v785_v18 = vpop.f32.mrf.mxu3  ;;  %1532 = vmatpush.bf16.msrb.mxu3 %v2204_v56 }
 0x1f3   :  { %v2562_v23 = vpop.f32.mrf.mxu1  ;;  %v833_v36 = vmax.f32 %v829_v26, 0.0 }
 0x1f4   :  { %v816_v27 = vsel %vm473_vm4, %v812_v17, %v809_v55  ;;  %v813_v28 = vsel %vm473_vm4, %v811_v52, %v812_v17  ;;  %v2572_v40 = vpop.f32.mrf.mxu0  ;;  %v1219_v4 = vrot.slane %v2562_v23, 5  ;;  %v1217_v17 = vsel %vm1214_vm10, %v1210_v8, %v1211_v2 }
 0x1f5   :  { %v817_v29 = vadd.f32 %v816_v27, %v805_v22  ;;  %v820_v31 = vadd.f32 %v813_v28, %v808_v39 }
 0x1f6   :  { %1533 = vmatpush.bf16.msrb.mxu3 %v2203_v0 }
 0x1f7   :  { %v821_v33 = vadd.f32 %v817_v29, %v2526_v11  ;;  %v824_v34 = vadd.f32 %v820_v31, %v785_v18  ;;  %v843_v11 = vsel %vm835_vm9, %v833_v36, 0.0  ;;  %v1216_v18 = vsel %vm1214_vm10, %v1211_v2, %v1212_v3 }
 0x1f9   :  { %v827_v14 = vadd.f32 %v2225_v44, %v821_v33  ;;  %v830_v37 = vadd.f32 %v2225_v44, %v824_v34  ;;  %v2570_v38 = vpop.f32.mrf.mxu2  ;;  %v2201_v33 = vld [vmem:[#allocation10 + $0x80] sm:$0xff]  ;;  %v1213_v34 = vrot.slane %v2556_v10, 4 }
 0x1fa   :  { %v2574_v41 = vpop.f32.mrf.mxu3  ;;  %v1231_v16 = vrot.slane %v2570_v38, 6  ;;  %1534 = vmatpush.bf16.msrb.mxu3 %v2202_v21 }
 0x1fb   :  { %v831_v43 = vmax.f32 %v827_v14, 0.0  ;;  %v834_v45 = vmax.f32 %v830_v37, 0.0  ;;  %v1145_v46 = vpop.f32.mrf.mxu1  ;;  %v1243_v42 = vrot.slane %v2574_v41, 7  ;;  %v1215_v10 = vsel %vm1214_vm10, %v1212_v3, %v1213_v34 }
 0x1fc   :  { %v1220_v57 = vrot.slane %v1145_v46, 5  ;;  %v2576_v60 = vpop.f32.mrf.mxu0 }
 0x1fd   :  { %v841_v48 = vsel %vm835_vm9, %v831_v43, 0.0  ;;  %v852_v49 = vmax.f32 %v843_v11, %v834_v45 }
 0x1fe   :  { %v845_v50 = vmax.f32 %v841_v48, %v832_v47  ;;  %v1225_v9 = vsel %vm792_vm7, %v1219_v4, %v1220_v57  ;;  %1535 = vmatpush.bf16.msrb.mxu3 %v2201_v33  ;;  %v1218_v48 = vsel %vm1214_vm10, %v1213_v34, %v1210_v8 }
 0x1ff   :  { %v853_v30 = vrot.slane %v852_v49, 4  ;;  %v1228_v39 = vadd.f32 %v1225_v9, %v1217_v17 }
 0x200   :  { %v846_v52 = vrot.slane %v845_v50, 4 }
 0x201   :  { %v854_v53 = vmax.f32 %v852_v49, %v853_v30  ;;  %v1164_v54 = vpop.f32.mrf.mxu2 }
 0x202   :  { %v847_v24 = vmax.f32 %v845_v50, %v846_v52  ;;  %v1183_v55 = vpop.f32.mrf.mxu3  ;;  %v1232_v7 = vrot.slane %v1164_v54, 6  ;;  %v2226_v54 = vld [vmem:[#allocation8 + $0x2] ss:$0 sm:$0xff] }
 0x203   :  { %v855_v58 = vrot.slane %v854_v53, 2  ;;  %v1148_v59 = vpop.f32.mrf.mxu1  ;;  %v1244_v28 = vrot.slane %v1183_v55, 7 }
 0x204   :  { %v1221_v61 = vrot.slane %v1148_v59, 5  ;;  %v848_v62 = vrot.slane %v847_v24, 2  ;;  %v1237_v23 = vsel %vm464_vm5, %v1231_v16, %v1232_v7  ;;  %v1205_v37 = vpop.f32.mrf.mxu0 }
 0x205   :  { %v856_v19 = vmax.f32 %v854_v53, %v855_v58  ;;  %v1240_v14 = vadd.f32 %v1237_v23, %v1228_v39  ;;  %v1249_v47 = vsel %vm473_vm4, %v1243_v42, %v1244_v28 }
 0x206   :  { %v849_v5 = vmax.f32 %v847_v24, %v848_v62  ;;  %v1224_v12 = vsel %vm792_vm7, %v1220_v57, %v1221_v61 }
 0x207   :  { %v857_v6 = vrot.slane %v856_v19, 1  ;;  %v1229_v25 = vadd.f32 %v1224_v12, %v1216_v18  ;;  %v1252_v41 = vadd.f32 %v1249_v47, %v1240_v14 }
 0x208   :  { %v850_v13 = vrot.slane %v849_v5, 1 }
 0x209   :  { %v858_v15 = vmax.f32 %v856_v19, %v857_v6  ;;  %v1167_v44 = vpop.f32.mrf.mxu2  ;;  %v1256_v59 = vadd.f32 %v1252_v41, %v2576_v60 }
 0x20a   :  { %v1233_v63 = vrot.slane %v1167_v44, 6  ;;  %v1186_v20 = vpop.f32.mrf.mxu3  ;;  %v851_v22 = vmax.f32 %v849_v5, %v850_v13 }
 0x20b   :  { %v1245_v26 = vrot.slane %v1186_v20, 7  ;;  %v1150_v27 = vpop.f32.mrf.mxu1  ;;  %v1262_v5 = vadd.f32 %v2226_v54, %v1256_v59 }
 0x20c   :  { %v1236_v29 = vsel %vm464_vm5, %v1232_v7, %v1233_v63  ;;  %v1222_v31 = vrot.slane %v1150_v27, 5  ;;  %v1300_v32 = vsel %vm1295_vm8, %v858_v15, %v851_v22  ;;  %v1207_v2 = vpop.f32.mrf.mxu0 }
 0x20d   :  { %v1241_v35 = vadd.f32 %v1236_v29, %v1229_v25  ;;  %v1307_v36 = vpack.c.bf16 %v1300_v32, %v1300_v32  ;;  %v1248_v38 = vsel %vm473_vm4, %v1244_v28, %v1245_v26  ;;  %v1266_v12 = vmax.f32 %v1262_v5, 0.0 }
 0x20e   :  { %v1223_v45 = vsel %vm792_vm7, %v1221_v61, %v1222_v31  ;;  %v1226_v46 = vsel %vm792_vm7, %v1222_v31, %v1219_v4 }
 0x20f   :  { %v1253_v43 = vadd.f32 %v1248_v38, %v1241_v35  ;;  %1523 = vmatmul.bf16.vlgmr.msrb.gmra.mxu2 %v1307_v36  ;;  %v1227_v30 = vadd.f32 %v1226_v46, %v1218_v48  ;;  %v1230_v52 = vadd.f32 %v1223_v45, %v1215_v10  ;;  %v2227_v35 = vld [vmem:[%s2634_s5] ss:$0 sm:$0xff] }
 0x211   :  { %v1169_v11 = vpop.f32.mrf.mxu2  ;;  %v1257_v49 = vadd.f32 %v1253_v43, %v1205_v37 }
 0x212   :  { %v1234_v50 = vrot.slane %v1169_v11, 6  ;;  %v1188_v51 = vpop.f32.mrf.mxu3 }
 0x213   :  { %v1246_v53 = vrot.slane %v1188_v51, 7  ;;  %v1263_v57 = vadd.f32 %v2226_v54, %v1257_v49 }
 0x214   :  { %v1235_v24 = vsel %vm464_vm5, %v1233_v63, %v1234_v50  ;;  %v1238_v55 = vsel %vm464_vm5, %v1234_v50, %v1231_v16 }
 0x215   :  { %v1239_v56 = vadd.f32 %v1238_v55, %v1227_v30  ;;  %v1242_v58 = vadd.f32 %v1235_v24, %v1230_v52  ;;  %v1247_v61 = vsel %vm473_vm4, %v1245_v26, %v1246_v53  ;;  %v1250_v62 = vsel %vm473_vm4, %v1246_v53, %v1243_v42 }
 0x216   :  { %v1267_v6 = vmax.f32 %v1263_v57, 0.0 }
 0x217   :  { %v1251_v0 = vadd.f32 %v1250_v62, %v1239_v56  ;;  %v1254_v19 = vadd.f32 %v1247_v61, %v1242_v58 }
 0x218   :  { %v1277_v13 = vsel %vm1269_vm11, %v1267_v6, 0.0 }
 0x219   :  { %v1255_v3 = vadd.f32 %v1251_v0, %v2572_v40  ;;  %v1258_v4 = vadd.f32 %v1254_v19, %v1207_v2 }
 0x21b   :  { %v1261_v7 = vadd.f32 %v2226_v54, %v1255_v3  ;;  %v1264_v8 = vadd.f32 %v2226_v54, %v1258_v4 }
 0x21d   :  { %v1265_v60 = vmax.f32 %v1261_v7, 0.0  ;;  %v1268_v9 = vmax.f32 %v1264_v8, 0.0 }
 0x21f   :  { %v1275_v21 = vsel %vm1269_vm11, %v1265_v60, 0.0  ;;  %v1286_v15 = vmax.f32 %v1277_v13, %v1268_v9 }
 0x220   :  { %v1279_v16 = vmax.f32 %v1275_v21, %v1266_v12 }
 0x221   :  { %v1287_v44 = vrot.slane %v1286_v15, 4 }
 0x222   :  { %v1280_v17 = vrot.slane %v1279_v16, 4 }
 0x223   :  { %v1288_v18 = vmax.f32 %v1286_v15, %v1287_v44 }
 0x224   :  { %v1281_v63 = vmax.f32 %v1279_v16, %v1280_v17 }
 0x225   :  { %v1289_v20 = vrot.slane %v1288_v18, 2 }
 0x226   :  { %v1282_v40 = vrot.slane %v1281_v63, 2 }
 0x227   :  { %v1290_v22 = vmax.f32 %v1288_v18, %v1289_v20 }
 0x228   :  { %v1283_v39 = vmax.f32 %v1281_v63, %v1282_v40 }
 0x229   :  { %v1291_v23 = vrot.slane %v1290_v22, 1 }
 0x22a   :  { %v1284_v25 = vrot.slane %v1283_v39, 1 }
 0x22b   :  { %v1292_v1 = vmax.f32 %v1290_v22, %v1291_v23 }
 0x22c   :  { %v1285_v26 = vmax.f32 %v1283_v39, %v1284_v25 }
 0x22e   :  { %v1304_v27 = vsel %vm1295_vm8, %v1292_v1, %v1285_v26 }
 0x22f   :  { %v1308_v28 = vpack.c.bf16 %v1304_v27, %v1304_v27 }
 0x231   :  { %1536 = vmatmul.bf16.vlgmr.msrb.gmra.mxu3 %v1308_v28 }
 0x26c   :  { %v1511_v29 = vpop.f32.mrf.mxu1 }
 0x274   :  { %v1513_v31 = vpop.f32.mrf.mxu1 }
 0x292   :  { %v1524_v32 = vpop.f32.mrf.mxu2 }
 0x293   :  { %v1525_v34 = vadd.f32 %v1524_v32, %v1511_v29 }
 0x29a   :  { %v1526_v33 = vpop.f32.mrf.mxu2 }
 0x2b4   :  { %v1537_v36 = vpop.f32.mrf.mxu3 }
 0x2b5   :  { %v1538_v14 = vadd.f32 %v1537_v36, %v1525_v34 }
 0x2b7   :  { %v1544_v37 = vadd.f32 %v2227_v35, %v1538_v14 }
 0x2b9   :  { %1545 = vst [vmem:[#allocation11] sm:$0x3] %v1544_v37 }
 0x2ba   :  { %1556 = dma.vmem_to_hbm [thread:$0]  %s1552_s24, 32, %s1554_s27, [#allocation4]  }
 0x2bc   :  { %v1539_v38 = vpop.f32.mrf.mxu3 }
 0x2bd   :  { %2378 = dma.done.wait [#allocation4], 32  }
 0x2be   :  { %2379 = vsyncadd [#allocation4], 4294967264 }
 0x2bf   :  { %1561 = vsyncpa [#allocation3], 1 }
 0x2c0   :  { %1562 = vsyncpa [#allocation6], 1 }
 0x2c1   :  { %1563 = vsyncpa [#allocation9], 1 }
 0x2c2   :  { %1564 = vsyncpa [#allocation4], 1 }

</bundles_post_ra>
